<compile_context>
chip_gen: v7x
topology: tpu7x:2x2x1
jax: 0.10.0
libtpu: 0.0.40
codegen_flags: <defaults>
</compile_context>

<pallas_src>
import functools
import math

import jax
import jax.numpy as jnp
from jax import lax
from jax.experimental import pallas as pl
from jax.experimental.pallas import tpu as pltpu

_LN_EPS = 1e-5
_VMEM_LIMIT = 64 * 1024 * 1024


def _layer_norm(z, gamma, beta):
    mean = jnp.mean(z, axis=-1, keepdims=True)
    var = jnp.mean(jnp.square(z - mean), axis=-1, keepdims=True)
    return (z - mean) * lax.rsqrt(var + _LN_EPS) * gamma + beta


def _pick_row_tile(m, cap=512):
    """Largest row tile (multiple of 8) dividing m with >=2 grid steps."""
    for t in (cap, 256, 128, 64, 32, 16, 8):
        if t <= m and m % t == 0 and m // t >= 2:
            return t
    return m


# ---------------------------------------------------------------------------
# Kernel 1: fused multi-head attention block
#   QKV projections + scaled-dot-product attention + combine_heads (raw view)
#   + W_o projection + residual add + LayerNorm, all in one kernel.
# Grid: one batch element per step ("parallel"); weights use constant index
# maps so they stay resident in VMEM across the batch grid.
# ---------------------------------------------------------------------------
def _mha_res_ln_kernel(num_heads, d_k,
                       q_ref, kv_ref,
                       wq_ref, bq_ref, wk_ref, bk_ref, wv_ref, bv_ref,
                       wo_ref, bo_ref, g_ref, b_ref,
                       out_ref, probs_ref):
    _, Sq, D = q_ref.shape
    _, Skv, _ = kv_ref.shape

    x_res = q_ref[0]                                    # (Sq, D) f32 residual
    x_bf = x_res.astype(jnp.bfloat16)
    kv_bf = kv_ref[0].astype(jnp.bfloat16)

    # Batched per-head projections: weights are (H, D, d_k) bf16 (pre-split in
    # the wrapper), so no lane-axis head slicing is needed anywhere.
    q_b = jnp.broadcast_to(x_bf, (num_heads, Sq, D))
    kv_b = jnp.broadcast_to(kv_bf, (num_heads, Skv, D))
    dn_proj = (((2,), (1,)), ((0,), (0,)))              # contract D, batch H
    q3 = lax.dot_general(q_b, wq_ref[...], dn_proj,
                         preferred_element_type=jnp.float32) + bq_ref[...]
    k3 = lax.dot_general(kv_b, wk_ref[...], dn_proj,
                         preferred_element_type=jnp.float32) + bk_ref[...]
    v3 = lax.dot_general(kv_b, wv_ref[...], dn_proj,
                         preferred_element_type=jnp.float32) + bv_ref[...]

    # Scaled dot-product attention, batched over heads, softmax in f32.
    scores = lax.dot_general(q3.astype(jnp.bfloat16), k3.astype(jnp.bfloat16),
                             (((2,), (2,)), ((0,), (0,))),
                             preferred_element_type=jnp.float32)
    scores = scores * (1.0 / math.sqrt(d_k))            # (H, Sq, Skv)
    m = jnp.max(scores, axis=-1, keepdims=True)
    e = jnp.exp(scores - m)
    denom = jnp.sum(e, axis=-1, keepdims=True)
    probs = e * pl.reciprocal(denom, approx=True)       # divide -> EUP slot
    probs_ref[0] = probs.astype(probs_ref.dtype)        # one full-block store

    ctx = lax.dot_general(probs.astype(jnp.bfloat16), v3.astype(jnp.bfloat16),
                          (((2,), (1,)), ((0,), (0,))),
                          preferred_element_type=jnp.float32)   # (H, Sq, d_k)

    # combine_heads in the PyTorch module is a raw .view of the contiguous
    # (H, Sq, d_k) buffer as (Sq, D).  Rebuild that exact row regrouping with
    # static 0/1 selection matmuls (exact, MXU-friendly, no lane reshape):
    #   combined[s, j*d_k:(j+1)*d_k] = stack[s*num_heads + j]
    stack = jnp.concatenate([ctx[h] for h in range(num_heads)], axis=0)
    stack_bf = stack.astype(jnp.bfloat16)               # (H*Sq, d_k)
    row_ids = lax.broadcasted_iota(jnp.int32, (Sq, num_heads * Sq), 0)
    col_ids = lax.broadcasted_iota(jnp.int32, (Sq, num_heads * Sq), 1)
    blocks = []
    for j in range(num_heads):
        sel = jnp.where(col_ids == row_ids * num_heads + j,
                        1.0, 0.0).astype(jnp.bfloat16)   # (Sq, H*Sq)
        blocks.append(jnp.dot(sel, stack_bf,
                              preferred_element_type=jnp.float32))
    combined = jnp.concatenate(blocks, axis=-1)          # (Sq, D)

    # W_o projection + residual add + LayerNorm fused (dropout == identity).
    y = jnp.dot(combined.astype(jnp.bfloat16), wo_ref[...],
                preferred_element_type=jnp.float32) + bo_ref[...]
    z = x_res + y
    out_ref[0] = _layer_norm(z, g_ref[...], b_ref[...]).astype(out_ref.dtype)


def _split_heads_weight(w, num_heads, d_k):
    d_model = w.shape[0]
    return w.reshape(d_model, num_heads, d_k).transpose(1, 0, 2).astype(jnp.bfloat16)


def _split_heads_bias(b, num_heads, d_k):
    return b.reshape(num_heads, d_k)[:, None, :].astype(jnp.float32)


def _mha_res_ln(q_in, kv_in, p, gamma, beta, num_heads):
    B, Sq, D = q_in.shape
    _, Skv, _ = kv_in.shape
    assert D % num_heads == 0
    d_k = D // num_heads

    wq = _split_heads_weight(p["wq"], num_heads, d_k)
    wk = _split_heads_weight(p["wk"], num_heads, d_k)
    wv = _split_heads_weight(p["wv"], num_heads, d_k)
    bq = _split_heads_bias(p["bq"], num_heads, d_k)
    bk = _split_heads_bias(p["bk"], num_heads, d_k)
    bv = _split_heads_bias(p["bv"], num_heads, d_k)
    wo = p["wo"].astype(jnp.bfloat16)

    kernel = functools.partial(_mha_res_ln_kernel, num_heads, d_k)
    w_spec = pl.BlockSpec((num_heads, D, d_k), lambda b: (0, 0, 0))
    hb_spec = pl.BlockSpec((num_heads, 1, d_k), lambda b: (0, 0, 0))
    vec_spec = pl.BlockSpec((1, D), lambda b: (0, 0))

    out, probs = pl.pallas_call(
        kernel,
        out_shape=(jax.ShapeDtypeStruct((B, Sq, D), jnp.float32),
                   jax.ShapeDtypeStruct((B, num_heads, Sq, Skv), jnp.float32)),
        grid_spec=pltpu.PrefetchScalarGridSpec(
            num_scalar_prefetch=0,
            grid=(B,),
            in_specs=[
                pl.BlockSpec((1, Sq, D), lambda b: (b, 0, 0)),
                pl.BlockSpec((1, Skv, D), lambda b: (b, 0, 0)),
                w_spec, hb_spec,     # W_q, b_q
                w_spec, hb_spec,     # W_k, b_k
                w_spec, hb_spec,     # W_v, b_v
                pl.BlockSpec((D, D), lambda b: (0, 0)),   # W_o
                vec_spec, vec_spec, vec_spec,             # b_o, gamma, beta
            ],
            out_specs=(
                pl.BlockSpec((1, Sq, D), lambda b: (b, 0, 0)),
                pl.BlockSpec((1, num_heads, Sq, Skv), lambda b: (b, 0, 0, 0)),
            ),
        ),
        compiler_params=pltpu.CompilerParams(
            dimension_semantics=("parallel",),
            vmem_limit_bytes=_VMEM_LIMIT),
    )(q_in, kv_in, wq, bq, wk, bk, wv, bv, wo, p["bo"], gamma, beta)
    return out, probs


# ---------------------------------------------------------------------------
# Kernel 2: position-wise FF (tanh) + residual add + LayerNorm (fused),
# with (B, S) flattened into the matmul M dimension and gridded over row tiles.
# ---------------------------------------------------------------------------
def _ff_res_ln_kernel(x_ref, w1_ref, b1_ref, w2_ref, b2_ref, g_ref, b_ref, o_ref):
    x = x_ref[...]                                       # (TM, D) f32
    x_bf = x.astype(jnp.bfloat16)
    h = jnp.tanh(jnp.dot(x_bf, w1_ref[...],
                         preferred_element_type=jnp.float32) + b1_ref[...])
    y = jnp.dot(h.astype(jnp.bfloat16), w2_ref[...],
                preferred_element_type=jnp.float32) + b2_ref[...]
    z = x + y                                            # dropout == identity
    o_ref[...] = _layer_norm(z, g_ref[...], b_ref[...]).astype(o_ref.dtype)


def _ff_res_ln(x, w1, b1, w2, b2, gamma, beta):
    B, S, D = x.shape
    d_ff = w1.shape[1]
    M = B * S
    x2 = x.reshape(M, D)
    tm = _pick_row_tile(M)
    # TODO(synk): for very large d_ff, additionally tile d_ff as an
    # "arbitrary" reduction axis; at these sizes the (tm, d_ff) intermediate
    # fits VMEM comfortably.
    out = pl.pallas_call(
        _ff_res_ln_kernel,
        out_shape=jax.ShapeDtypeStruct((M, D), jnp.float32),
        grid_spec=pltpu.PrefetchScalarGridSpec(
            num_scalar_prefetch=0,
            grid=(M // tm,),
            in_specs=[
                pl.BlockSpec((tm, D), lambda i: (i, 0)),
                pl.BlockSpec((D, d_ff), lambda i: (0, 0)),
                pl.BlockSpec((1, d_ff), lambda i: (0, 0)),
                pl.BlockSpec((d_ff, D), lambda i: (0, 0)),
                pl.BlockSpec((1, D), lambda i: (0, 0)),
                pl.BlockSpec((1, D), lambda i: (0, 0)),
                pl.BlockSpec((1, D), lambda i: (0, 0)),
            ],
            out_specs=pl.BlockSpec((tm, D), lambda i: (i, 0)),
        ),
        compiler_params=pltpu.CompilerParams(
            dimension_semantics=("parallel",),
            vmem_limit_bytes=_VMEM_LIMIT),
    )(x2, w1.astype(jnp.bfloat16), b1, w2.astype(jnp.bfloat16), b2, gamma, beta)
    return out.reshape(B, S, D)


# ---------------------------------------------------------------------------
# Full DecoderLayer forward.
# ---------------------------------------------------------------------------
def decoder_layer_forward(x, enc_output, params, num_heads):
    x1, self_probs = _mha_res_ln(x, x, params["self"],
                                 params["g1"], params["be1"], num_heads)
    x2, cross_probs = _mha_res_ln(x1, enc_output, params["cross"],
                                  params["g2"], params["be2"], num_heads)
    x3 = _ff_res_ln(x2, params["w1"], params["b1"], params["w2"], params["b2"],
                    params["g3"], params["be3"])
    return x3, self_probs, cross_probs


# ---------------------------------------------------------------------------
# Pure-JAX reference (mirrors the PyTorch module, including the transpose-free
# combine_heads view) for correctness checking.
# ---------------------------------------------------------------------------
def decoder_layer_ref(x, enc_output, params, num_heads):
    def mha(q_in, kv_in, p):
        B, Sq, D = q_in.shape
        dk = D // num_heads
        q = q_in @ p["wq"] + p["bq"][0]
        k = kv_in @ p["wk"] + p["bk"][0]
        v = kv_in @ p["wv"] + p["bv"][0]

        def split(t):
            b, s, _ = t.shape
            return t.reshape(b, s, num_heads, dk).transpose(0, 2, 1, 3)

        qh, kh, vh = split(q), split(k), split(v)
        scores = jnp.einsum("bhqd,bhkd->bhqk", qh, kh) / math.sqrt(dk)
        probs = jax.nn.softmax(scores, axis=-1)
        ctx = jnp.einsum("bhqk,bhkd->bhqd", probs, vh)   # (B, H, Sq, dk)
        combined = ctx.reshape(B, Sq, D)                 # raw-view faithful
        return combined @ p["wo"] + p["bo"][0], probs

    def ln(z, g, b):
        mean = z.mean(-1, keepdims=True)
        var = ((z - mean) ** 2).mean(-1, keepdims=True)
        return (z - mean) / jnp.sqrt(var + _LN_EPS) * g[0] + b[0]

    a1, p1 = mha(x, x, params["self"])
    x1 = ln(x + a1, params["g1"], params["be1"])
    a2, p2 = mha(x1, enc_output, params["cross"])
    x2 = ln(x1 + a2, params["g2"], params["be2"])
    h = jnp.tanh(x2 @ params["w1"] + params["b1"][0])
    ff = h @ params["w2"] + params["b2"][0]
    x3 = ln(x2 + ff, params["g3"], params["be3"])
    return x3, p1, p2


def _init_params(key, d_model, d_ff):
    ks = jax.random.split(key, 24)
    scale = 0.1
    it = iter(range(24))

    def lin(n_in, n_out):
        kw, kb = ks[next(it)], ks[next(it)]
        return (scale * jax.random.normal(kw, (n_in, n_out), jnp.float32),
                scale * jax.random.normal(kb, (1, n_out), jnp.float32))

    def attn():
        wq, bq = lin(d_model, d_model)
        wk, bk = lin(d_model, d_model)
        wv, bv = lin(d_model, d_model)
        wo, bo = lin(d_model, d_model)
        return {"wq": wq, "bq": bq, "wk": wk, "bk": bk,
                "wv": wv, "bv": bv, "wo": wo, "bo": bo}

    p = {"self": attn(), "cross": attn()}
    p["w1"], p["b1"] = lin(d_model, d_ff)
    p["w2"], p["b2"] = lin(d_ff, d_model)
    for i in (1, 2, 3):
        p[f"g{i}"] = jnp.ones((1, d_model), jnp.float32)
        p[f"be{i}"] = jnp.zeros((1, d_model), jnp.float32)
    return p


if __name__ == "__main__":
    d_model = 32
    num_heads = 4
    d_ff = 64
    batch = 2
    seq = 8

    key = jax.random.PRNGKey(0)
    kx, kenc, kp = jax.random.split(key, 3)
    x = jax.random.normal(kx, (batch, seq, d_model), dtype=jnp.float32)
    enc_output = jax.random.normal(kenc, (batch, seq, d_model), dtype=jnp.float32)
    params = _init_params(kp, d_model, d_ff)

    fwd = jax.jit(decoder_layer_forward, static_argnums=(3,))
    out, self_probs, cross_probs = jax.block_until_ready(
        fwd(x, enc_output, params, num_heads))

    ref_out, ref_self, ref_cross = decoder_layer_ref(x, enc_output, params, num_heads)

    assert out.shape == (batch, seq, d_model)
    assert self_probs.shape == (batch, num_heads, seq, seq)
    assert cross_probs.shape == (batch, num_heads, seq, seq)
    # Kernel uses bf16 MXU operands with f32 accumulation vs. an f32 reference.
    assert jnp.allclose(out, ref_out, atol=3e-2, rtol=3e-2), \
        float(jnp.max(jnp.abs(out - ref_out)))
    assert jnp.allclose(self_probs, ref_self, atol=3e-2, rtol=3e-2)
    assert jnp.allclose(cross_probs, ref_cross, atol=3e-2, rtol=3e-2)

    print("KERNEL_OK")
</pallas_src>

<mosaic_0001>
module attributes {stable_mosaic.version = 11 : i64} {
  func.func @_ff_res_ln_kernel(%arg0: i32, %arg1: memref<8x32xf32, #tpu.memory_space<vmem>>, %arg2: memref<32x64xbf16, #tpu.memory_space<vmem>>, %arg3: memref<1x64xf32, #tpu.memory_space<vmem>>, %arg4: memref<64x32xbf16, #tpu.memory_space<vmem>>, %arg5: memref<1x32xf32, #tpu.memory_space<vmem>>, %arg6: memref<1x32xf32, #tpu.memory_space<vmem>>, %arg7: memref<1x32xf32, #tpu.memory_space<vmem>>, %arg8: memref<8x32xf32, #tpu.memory_space<vmem>>) attributes {dimension_semantics = [#tpu.dimension_semantics<parallel>], iteration_bounds = array<i64: 2>, scalar_prefetch = 0 : i64, scratch_operands = 0 : i64, tpu.core_type = #tpu.core_type<tc>, window_params = [{transform_indices = @transform_0, window_bounds = array<i64: 8, 32>}, {pipeline_mode = #tpu.pipeline_mode<synchronous>, transform_indices = @transform_1, window_bounds = array<i64: 32, 64>}, {pipeline_mode = #tpu.pipeline_mode<synchronous>, transform_indices = @transform_2, window_bounds = array<i64: 1, 64>}, {pipeline_mode = #tpu.pipeline_mode<synchronous>, transform_indices = @transform_3, window_bounds = array<i64: 64, 32>}, {pipeline_mode = #tpu.pipeline_mode<synchronous>, transform_indices = @transform_4, window_bounds = array<i64: 1, 32>}, {pipeline_mode = #tpu.pipeline_mode<synchronous>, transform_indices = @transform_5, window_bounds = array<i64: 1, 32>}, {pipeline_mode = #tpu.pipeline_mode<synchronous>, transform_indices = @transform_6, window_bounds = array<i64: 1, 32>}, {transform_indices = @transform_7, window_bounds = array<i64: 8, 32>}]} {
    %c0 = arith.constant 0 : index
    %c0_0 = arith.constant 0 : index
    %0 = vector.load %arg1[%c0, %c0_0] : memref<8x32xf32, #tpu.memory_space<vmem>>, vector<8x32xf32>
    %1 = arith.truncf %0 : vector<8x32xf32> to vector<8x32xbf16>
    %c0_1 = arith.constant 0 : index
    %c0_2 = arith.constant 0 : index
    %2 = vector.load %arg2[%c0_1, %c0_2] : memref<32x64xbf16, #tpu.memory_space<vmem>>, vector<32x64xbf16>
    %cst = arith.constant dense<0.000000e+00> : vector<8x64xf32>
    %3 = tpu.matmul %1, %2, %cst {dimension_numbers = #tpu.dot_dimension_numbers<[1], [0], [0], [1], [0, 0, 1, 1], [], []>} : vector<8x32xbf16>, vector<32x64xbf16>, vector<8x64xf32> -> vector<8x64xf32>
    %c0_3 = arith.constant 0 : index
    %c0_4 = arith.constant 0 : index
    %4 = vector.load %arg3[%c0_3, %c0_4] : memref<1x64xf32, #tpu.memory_space<vmem>>, vector<1x64xf32>
    %5 = vector.broadcast %4 : vector<1x64xf32> to vector<8x64xf32>
    %6 = arith.addf %3, %5 : vector<8x64xf32>
    %7 = math.tanh %6 : vector<8x64xf32>
    %8 = arith.truncf %7 : vector<8x64xf32> to vector<8x64xbf16>
    %c0_5 = arith.constant 0 : index
    %c0_6 = arith.constant 0 : index
    %9 = vector.load %arg4[%c0_5, %c0_6] : memref<64x32xbf16, #tpu.memory_space<vmem>>, vector<64x32xbf16>
    %cst_7 = arith.constant dense<0.000000e+00> : vector<8x32xf32>
    %10 = tpu.matmul %8, %9, %cst_7 {dimension_numbers = #tpu.dot_dimension_numbers<[1], [0], [0], [1], [0, 0, 1, 1], [], []>} : vector<8x64xbf16>, vector<64x32xbf16>, vector<8x32xf32> -> vector<8x32xf32>
    %c0_8 = arith.constant 0 : index
    %c0_9 = arith.constant 0 : index
    %11 = vector.load %arg5[%c0_8, %c0_9] : memref<1x32xf32, #tpu.memory_space<vmem>>, vector<1x32xf32>
    %12 = vector.broadcast %11 : vector<1x32xf32> to vector<8x32xf32>
    %13 = arith.addf %10, %12 : vector<8x32xf32>
    %14 = arith.addf %0, %13 : vector<8x32xf32>
    %c0_10 = arith.constant 0 : index
    %c0_11 = arith.constant 0 : index
    %15 = vector.load %arg6[%c0_10, %c0_11] : memref<1x32xf32, #tpu.memory_space<vmem>>, vector<1x32xf32>
    %c0_12 = arith.constant 0 : index
    %c0_13 = arith.constant 0 : index
    %16 = vector.load %arg7[%c0_12, %c0_13] : memref<1x32xf32, #tpu.memory_space<vmem>>, vector<1x32xf32>
    %cst_14 = arith.constant dense<0.000000e+00> : vector<8xf32>
    %17 = vector.multi_reduction <add>, %14, %cst_14 [1] : vector<8x32xf32> to vector<8xf32>
    %18 = vector.shape_cast %17 : vector<8xf32> to vector<8x1xf32>
    %cst_15 = arith.constant 3.200000e+01 : f32
    %19 = vector.broadcast %cst_15 : f32 to vector<8x1xf32>
    %20 = arith.divf %18, %19 : vector<8x1xf32>
    %21 = vector.broadcast %20 : vector<8x1xf32> to vector<8x32xf32>
    %22 = arith.subf %14, %21 : vector<8x32xf32>
    %23 = arith.mulf %22, %22 : vector<8x32xf32>
    %cst_16 = arith.constant dense<0.000000e+00> : vector<8xf32>
    %24 = vector.multi_reduction <add>, %23, %cst_16 [1] : vector<8x32xf32> to vector<8xf32>
    %25 = vector.shape_cast %24 : vector<8xf32> to vector<8x1xf32>
    %cst_17 = arith.constant 3.200000e+01 : f32
    %26 = vector.broadcast %cst_17 : f32 to vector<8x1xf32>
    %27 = arith.divf %25, %26 : vector<8x1xf32>
    %28 = vector.broadcast %20 : vector<8x1xf32> to vector<8x32xf32>
    %29 = arith.subf %14, %28 : vector<8x32xf32>
    %cst_18 = arith.constant 9.99999974E-6 : f32
    %30 = vector.broadcast %cst_18 : f32 to vector<8x1xf32>
    %31 = arith.addf %27, %30 : vector<8x1xf32>
    %32 = math.rsqrt %31 : vector<8x1xf32>
    %33 = vector.broadcast %32 : vector<8x1xf32> to vector<8x32xf32>
    %34 = arith.mulf %29, %33 : vector<8x32xf32>
    %35 = vector.broadcast %15 : vector<1x32xf32> to vector<8x32xf32>
    %36 = arith.mulf %34, %35 : vector<8x32xf32>
    %37 = vector.broadcast %16 : vector<1x32xf32> to vector<8x32xf32>
    %38 = arith.addf %36, %37 : vector<8x32xf32>
    %c0_19 = arith.constant 0 : index
    %c0_20 = arith.constant 0 : index
    %39 = vector.load %arg8[%c0_19, %c0_20] : memref<8x32xf32, #tpu.memory_space<vmem>>, vector<8x32xf32>
    tpu.vector_store %arg8[%c0_19, %c0_20], %38 {strides = array<i32>} : memref<8x32xf32, #tpu.memory_space<vmem>>, vector<8x32xf32>,
    return
  }
  func.func @transform_0(%arg0: i32) -> (i32, i32) {
    %c0_i32 = arith.constant 0 : i32
    %c0_i32_0 = arith.constant 0 : i32
    return %arg0, %c0_i32 : i32, i32
  }
  func.func @transform_1(%arg0: i32) -> (i32, i32) {
    %c0_i32 = arith.constant 0 : i32
    %c0_i32_0 = arith.constant 0 : i32
    %c0_i32_1 = arith.constant 0 : i32
    return %c0_i32, %c0_i32_0 : i32, i32
  }
  func.func @transform_2(%arg0: i32) -> (i32, i32) {
    %c0_i32 = arith.constant 0 : i32
    %c0_i32_0 = arith.constant 0 : i32
    %c0_i32_1 = arith.constant 0 : i32
    return %c0_i32, %c0_i32_0 : i32, i32
  }
  func.func @transform_3(%arg0: i32) -> (i32, i32) {
    %c0_i32 = arith.constant 0 : i32
    %c0_i32_0 = arith.constant 0 : i32
    %c0_i32_1 = arith.constant 0 : i32
    return %c0_i32, %c0_i32_0 : i32, i32
  }
  func.func @transform_4(%arg0: i32) -> (i32, i32) {
    %c0_i32 = arith.constant 0 : i32
    %c0_i32_0 = arith.constant 0 : i32
    %c0_i32_1 = arith.constant 0 : i32
    return %c0_i32, %c0_i32_0 : i32, i32
  }
  func.func @transform_5(%arg0: i32) -> (i32, i32) {
    %c0_i32 = arith.constant 0 : i32
    %c0_i32_0 = arith.constant 0 : i32
    %c0_i32_1 = arith.constant 0 : i32
    return %c0_i32, %c0_i32_0 : i32, i32
  }
  func.func @transform_6(%arg0: i32) -> (i32, i32) {
    %c0_i32 = arith.constant 0 : i32
    %c0_i32_0 = arith.constant 0 : i32
    %c0_i32_1 = arith.constant 0 : i32
    return %c0_i32, %c0_i32_0 : i32, i32
  }
  func.func @transform_7(%arg0: i32) -> (i32, i32) {
    %c0_i32 = arith.constant 0 : i32
    %c0_i32_0 = arith.constant 0 : i32
    return %arg0, %c0_i32 : i32, i32
  }
}

module attributes {stable_mosaic.version = 11 : i64} {
  func.func @_mha_res_ln_kernel(%arg0: i32, %arg1: memref<1x8x32xf32, #tpu.memory_space<vmem>>, %arg2: memref<1x8x32xf32, #tpu.memory_space<vmem>>, %arg3: memref<4x32x8xbf16, #tpu.memory_space<vmem>>, %arg4: memref<4x1x8xf32, #tpu.memory_space<vmem>>, %arg5: memref<4x32x8xbf16, #tpu.memory_space<vmem>>, %arg6: memref<4x1x8xf32, #tpu.memory_space<vmem>>, %arg7: memref<4x32x8xbf16, #tpu.memory_space<vmem>>, %arg8: memref<4x1x8xf32, #tpu.memory_space<vmem>>, %arg9: memref<32x32xbf16, #tpu.memory_space<vmem>>, %arg10: memref<1x32xf32, #tpu.memory_space<vmem>>, %arg11: memref<1x32xf32, #tpu.memory_space<vmem>>, %arg12: memref<1x32xf32, #tpu.memory_space<vmem>>, %arg13: memref<1x8x32xf32, #tpu.memory_space<vmem>>, %arg14: memref<1x4x8x8xf32, #tpu.memory_space<vmem>>) attributes {dimension_semantics = [#tpu.dimension_semantics<parallel>], iteration_bounds = array<i64: 2>, scalar_prefetch = 0 : i64, scratch_operands = 0 : i64, tpu.core_type = #tpu.core_type<tc>, window_params = [{transform_indices = @transform_0, window_bounds = array<i64: 1, 8, 32>}, {transform_indices = @transform_1, window_bounds = array<i64: 1, 8, 32>}, {pipeline_mode = #tpu.pipeline_mode<synchronous>, transform_indices = @transform_2, window_bounds = array<i64: 4, 32, 8>}, {pipeline_mode = #tpu.pipeline_mode<synchronous>, transform_indices = @transform_3, window_bounds = array<i64: 4, 1, 8>}, {pipeline_mode = #tpu.pipeline_mode<synchronous>, transform_indices = @transform_4, window_bounds = array<i64: 4, 32, 8>}, {pipeline_mode = #tpu.pipeline_mode<synchronous>, transform_indices = @transform_5, window_bounds = array<i64: 4, 1, 8>}, {pipeline_mode = #tpu.pipeline_mode<synchronous>, transform_indices = @transform_6, window_bounds = array<i64: 4, 32, 8>}, {pipeline_mode = #tpu.pipeline_mode<synchronous>, transform_indices = @transform_7, window_bounds = array<i64: 4, 1, 8>}, {pipeline_mode = #tpu.pipeline_mode<synchronous>, transform_indices = @transform_8, window_bounds = array<i64: 32, 32>}, {pipeline_mode = #tpu.pipeline_mode<synchronous>, transform_indices = @transform_9, window_bounds = array<i64: 1, 32>}, {pipeline_mode = #tpu.pipeline_mode<synchronous>, transform_indices = @transform_10, window_bounds = array<i64: 1, 32>}, {pipeline_mode = #tpu.pipeline_mode<synchronous>, transform_indices = @transform_11, window_bounds = array<i64: 1, 32>}, {transform_indices = @transform_12, window_bounds = array<i64: 1, 8, 32>}, {transform_indices = @transform_13, window_bounds = array<i64: 1, 4, 8, 8>}]} {
    %c0 = arith.constant 0 : index
    %c0_0 = arith.constant 0 : index
    %c0_1 = arith.constant 0 : index
    %0 = vector.load %arg1[%c0, %c0_0, %c0_1] : memref<1x8x32xf32, #tpu.memory_space<vmem>>, vector<1x8x32xf32>
    %1 = vector.shape_cast %0 : vector<1x8x32xf32> to vector<8x32xf32>
    %2 = arith.truncf %1 : vector<8x32xf32> to vector<8x32xbf16>
    %c0_2 = arith.constant 0 : index
    %c0_3 = arith.constant 0 : index
    %c0_4 = arith.constant 0 : index
    %3 = vector.load %arg2[%c0_2, %c0_3, %c0_4] : memref<1x8x32xf32, #tpu.memory_space<vmem>>, vector<1x8x32xf32>
    %4 = vector.shape_cast %3 : vector<1x8x32xf32> to vector<8x32xf32>
    %5 = arith.truncf %4 : vector<8x32xf32> to vector<8x32xbf16>
    %6 = vector.shape_cast %2 : vector<8x32xbf16> to vector<1x8x32xbf16>
    %7 = vector.broadcast %6 : vector<1x8x32xbf16> to vector<4x8x32xbf16>
    %8 = vector.shape_cast %5 : vector<8x32xbf16> to vector<1x8x32xbf16>
    %9 = vector.broadcast %8 : vector<1x8x32xbf16> to vector<4x8x32xbf16>
    %c0_5 = arith.constant 0 : index
    %c0_6 = arith.constant 0 : index
    %c0_7 = arith.constant 0 : index
    %10 = vector.load %arg3[%c0_5, %c0_6, %c0_7] : memref<4x32x8xbf16, #tpu.memory_space<vmem>>, vector<4x32x8xbf16>
    %cst = arith.constant dense<0.000000e+00> : vector<4x8x8xf32>
    %11 = tpu.matmul %7, %10, %cst {dimension_numbers = #tpu.dot_dimension_numbers<[2], [1], [1], [2], [0, 0, 0, 1, 1, 2], [0], [0]>} : vector<4x8x32xbf16>, vector<4x32x8xbf16>, vector<4x8x8xf32> -> vector<4x8x8xf32>
    %c0_8 = arith.constant 0 : index
    %c0_9 = arith.constant 0 : index
    %c0_10 = arith.constant 0 : index
    %12 = vector.load %arg4[%c0_8, %c0_9, %c0_10] : memref<4x1x8xf32, #tpu.memory_space<vmem>>, vector<4x1x8xf32>
    %13 = vector.broadcast %12 : vector<4x1x8xf32> to vector<4x8x8xf32>
    %14 = arith.addf %11, %13 : vector<4x8x8xf32>
    %c0_11 = arith.constant 0 : index
    %c0_12 = arith.constant 0 : index
    %c0_13 = arith.constant 0 : index
    %15 = vector.load %arg5[%c0_11, %c0_12, %c0_13] : memref<4x32x8xbf16, #tpu.memory_space<vmem>>, vector<4x32x8xbf16>
    %cst_14 = arith.constant dense<0.000000e+00> : vector<4x8x8xf32>
    %16 = tpu.matmul %9, %15, %cst_14 {dimension_numbers = #tpu.dot_dimension_numbers<[2], [1], [1], [2], [0, 0, 0, 1, 1, 2], [0], [0]>} : vector<4x8x32xbf16>, vector<4x32x8xbf16>, vector<4x8x8xf32> -> vector<4x8x8xf32>
    %c0_15 = arith.constant 0 : index
    %c0_16 = arith.constant 0 : index
    %c0_17 = arith.constant 0 : index
    %17 = vector.load %arg6[%c0_15, %c0_16, %c0_17] : memref<4x1x8xf32, #tpu.memory_space<vmem>>, vector<4x1x8xf32>
    %18 = vector.broadcast %17 : vector<4x1x8xf32> to vector<4x8x8xf32>
    %19 = arith.addf %16, %18 : vector<4x8x8xf32>
    %c0_18 = arith.constant 0 : index
    %c0_19 = arith.constant 0 : index
    %c0_20 = arith.constant 0 : index
    %20 = vector.load %arg7[%c0_18, %c0_19, %c0_20] : memref<4x32x8xbf16, #tpu.memory_space<vmem>>, vector<4x32x8xbf16>
    %cst_21 = arith.constant dense<0.000000e+00> : vector<4x8x8xf32>
    %21 = tpu.matmul %9, %20, %cst_21 {dimension_numbers = #tpu.dot_dimension_numbers<[2], [1], [1], [2], [0, 0, 0, 1, 1, 2], [0], [0]>} : vector<4x8x32xbf16>, vector<4x32x8xbf16>, vector<4x8x8xf32> -> vector<4x8x8xf32>
    %c0_22 = arith.constant 0 : index
    %c0_23 = arith.constant 0 : index
    %c0_24 = arith.constant 0 : index
    %22 = vector.load %arg8[%c0_22, %c0_23, %c0_24] : memref<4x1x8xf32, #tpu.memory_space<vmem>>, vector<4x1x8xf32>
    %23 = vector.broadcast %22 : vector<4x1x8xf32> to vector<4x8x8xf32>
    %24 = arith.addf %21, %23 : vector<4x8x8xf32>
    %25 = arith.truncf %14 : vector<4x8x8xf32> to vector<4x8x8xbf16>
    %26 = arith.truncf %19 : vector<4x8x8xf32> to vector<4x8x8xbf16>
    %cst_25 = arith.constant dense<0.000000e+00> : vector<4x8x8xf32>
    %27 = tpu.matmul %25, %26, %cst_25 {dimension_numbers = #tpu.dot_dimension_numbers<[2], [2], [1], [1], [0, 0, 0, 1, 1, 1], [0], [0]>} : vector<4x8x8xbf16>, vector<4x8x8xbf16>, vector<4x8x8xf32> -> vector<4x8x8xf32>
    %cst_26 = arith.constant 0.353553385 : f32
    %28 = vector.broadcast %cst_26 : f32 to vector<4x8x8xf32>
    %29 = arith.mulf %27, %28 : vector<4x8x8xf32>
    %cst_27 = arith.constant dense<0xFF800000> : vector<4x8xf32>
    %30 = vector.multi_reduction <maximumf>, %29, %cst_27 [2] : vector<4x8x8xf32> to vector<4x8xf32>
    %31 = vector.shape_cast %30 : vector<4x8xf32> to vector<4x8x1xf32>
    %32 = vector.broadcast %31 : vector<4x8x1xf32> to vector<4x8x8xf32>
    %33 = arith.subf %29, %32 : vector<4x8x8xf32>
    %34 = math.exp %33 : vector<4x8x8xf32>
    %cst_28 = arith.constant dense<0.000000e+00> : vector<4x8xf32>
    %35 = vector.multi_reduction <add>, %34, %cst_28 [2] : vector<4x8x8xf32> to vector<4x8xf32>
    %36 = vector.shape_cast %35 : vector<4x8xf32> to vector<4x8x1xf32>
    %37 = tpu.reciprocal %36 {approx = true} : vector<4x8x1xf32> -> vector<4x8x1xf32>
    %38 = vector.broadcast %37 : vector<4x8x1xf32> to vector<4x8x8xf32>
    %39 = arith.mulf %34, %38 : vector<4x8x8xf32>
    %c0_29 = arith.constant 0 : index
    %c0_30 = arith.constant 0 : index
    %c0_31 = arith.constant 0 : index
    %c0_32 = arith.constant 0 : index
    %40 = vector.load %arg14[%c0_29, %c0_30, %c0_31, %c0_32] : memref<1x4x8x8xf32, #tpu.memory_space<vmem>>, vector<1x4x8x8xf32>
    %41 = vector.shape_cast %40 : vector<1x4x8x8xf32> to vector<4x8x8xf32>
    %42 = vector.shape_cast %39 : vector<4x8x8xf32> to vector<1x4x8x8xf32>
    tpu.vector_store %arg14[%c0_29, %c0_30, %c0_31, %c0_32], %42 {strides = array<i32>} : memref<1x4x8x8xf32, #tpu.memory_space<vmem>>, vector<1x4x8x8xf32>,
    %43 = arith.truncf %39 : vector<4x8x8xf32> to vector<4x8x8xbf16>
    %44 = arith.truncf %24 : vector<4x8x8xf32> to vector<4x8x8xbf16>
    %cst_33 = arith.constant dense<0.000000e+00> : vector<4x8x8xf32>
    %45 = tpu.matmul %43, %44, %cst_33 {dimension_numbers = #tpu.dot_dimension_numbers<[2], [1], [1], [2], [0, 0, 0, 1, 1, 2], [0], [0]>} : vector<4x8x8xbf16>, vector<4x8x8xbf16>, vector<4x8x8xf32> -> vector<4x8x8xf32>
    %46 = vector.extract_strided_slice %45 {offsets = [0, 0, 0], sizes = [1, 8, 8], strides = [1, 1, 1]} : vector<4x8x8xf32> to vector<1x8x8xf32>
    %47 = vector.shape_cast %46 : vector<1x8x8xf32> to vector<8x8xf32>
    %48 = vector.extract_strided_slice %45 {offsets = [1, 0, 0], sizes = [1, 8, 8], strides = [1, 1, 1]} : vector<4x8x8xf32> to vector<1x8x8xf32>
    %49 = vector.shape_cast %48 : vector<1x8x8xf32> to vector<8x8xf32>
    %50 = vector.extract_strided_slice %45 {offsets = [2, 0, 0], sizes = [1, 8, 8], strides = [1, 1, 1]} : vector<4x8x8xf32> to vector<1x8x8xf32>
    %51 = vector.shape_cast %50 : vector<1x8x8xf32> to vector<8x8xf32>
    %52 = vector.extract_strided_slice %45 {offsets = [3, 0, 0], sizes = [1, 8, 8], strides = [1, 1, 1]} : vector<4x8x8xf32> to vector<1x8x8xf32>
    %53 = vector.shape_cast %52 : vector<1x8x8xf32> to vector<8x8xf32>
    %54 = tpu.concatenate %47, %49, %51, %53 in 0 : vector<8x8xf32>, vector<8x8xf32>, vector<8x8xf32>, vector<8x8xf32> -> vector<32x8xf32>
    %55 = arith.truncf %54 : vector<32x8xf32> to vector<32x8xbf16>
    %56 = tpu.iota {dimensions = array<i32: 0>} : vector<8x32xi32>
    %57 = tpu.iota {dimensions = array<i32: 1>} : vector<8x32xi32>
    %c4_i32 = arith.constant 4 : i32
    %58 = vector.broadcast %c4_i32 : i32 to vector<8x32xi32>
    %59 = arith.muli %56, %58 : vector<8x32xi32>
    %c0_i32 = arith.constant 0 : i32
    %60 = vector.broadcast %c0_i32 : i32 to vector<8x32xi32>
    %61 = arith.addi %59, %60 : vector<8x32xi32>
    %62 = arith.cmpi eq, %57, %61 : vector<8x32xi32>
    %cst_34 = arith.constant 1.000000e+00 : f32
    %cst_35 = arith.constant 0.000000e+00 : f32
    %63 = vector.broadcast %cst_34 : f32 to vector<8x32xf32>
    %64 = vector.broadcast %cst_35 : f32 to vector<8x32xf32>
    %65 = arith.select %62, %63, %64 : vector<8x32xi1>, vector<8x32xf32>
    %66 = arith.truncf %65 : vector<8x32xf32> to vector<8x32xbf16>
    %cst_36 = arith.constant dense<0.000000e+00> : vector<8x8xf32>
    %67 = tpu.matmul %66, %55, %cst_36 {dimension_numbers = #tpu.dot_dimension_numbers<[1], [0], [0], [1], [0, 0, 1, 1], [], []>} : vector<8x32xbf16>, vector<32x8xbf16>, vector<8x8xf32> -> vector<8x8xf32>
    %c4_i32_37 = arith.constant 4 : i32
    %68 = vector.broadcast %c4_i32_37 : i32 to vector<8x32xi32>
    %69 = arith.muli %56, %68 : vector<8x32xi32>
    %c1_i32 = arith.constant 1 : i32
    %70 = vector.broadcast %c1_i32 : i32 to vector<8x32xi32>
    %71 = arith.addi %69, %70 : vector<8x32xi32>
    %72 = arith.cmpi eq, %57, %71 : vector<8x32xi32>
    %cst_38 = arith.constant 1.000000e+00 : f32
    %cst_39 = arith.constant 0.000000e+00 : f32
    %73 = vector.broadcast %cst_38 : f32 to vector<8x32xf32>
    %74 = vector.broadcast %cst_39 : f32 to vector<8x32xf32>
    %75 = arith.select %72, %73, %74 : vector<8x32xi1>, vector<8x32xf32>
    %76 = arith.truncf %75 : vector<8x32xf32> to vector<8x32xbf16>
    %cst_40 = arith.constant dense<0.000000e+00> : vector<8x8xf32>
    %77 = tpu.matmul %76, %55, %cst_40 {dimension_numbers = #tpu.dot_dimension_numbers<[1], [0], [0], [1], [0, 0, 1, 1], [], []>} : vector<8x32xbf16>, vector<32x8xbf16>, vector<8x8xf32> -> vector<8x8xf32>
    %c4_i32_41 = arith.constant 4 : i32
    %78 = vector.broadcast %c4_i32_41 : i32 to vector<8x32xi32>
    %79 = arith.muli %56, %78 : vector<8x32xi32>
    %c2_i32 = arith.constant 2 : i32
    %80 = vector.broadcast %c2_i32 : i32 to vector<8x32xi32>
    %81 = arith.addi %79, %80 : vector<8x32xi32>
    %82 = arith.cmpi eq, %57, %81 : vector<8x32xi32>
    %cst_42 = arith.constant 1.000000e+00 : f32
    %cst_43 = arith.constant 0.000000e+00 : f32
    %83 = vector.broadcast %cst_42 : f32 to vector<8x32xf32>
    %84 = vector.broadcast %cst_43 : f32 to vector<8x32xf32>
    %85 = arith.select %82, %83, %84 : vector<8x32xi1>, vector<8x32xf32>
    %86 = arith.truncf %85 : vector<8x32xf32> to vector<8x32xbf16>
    %cst_44 = arith.constant dense<0.000000e+00> : vector<8x8xf32>
    %87 = tpu.matmul %86, %55, %cst_44 {dimension_numbers = #tpu.dot_dimension_numbers<[1], [0], [0], [1], [0, 0, 1, 1], [], []>} : vector<8x32xbf16>, vector<32x8xbf16>, vector<8x8xf32> -> vector<8x8xf32>
    %c4_i32_45 = arith.constant 4 : i32
    %88 = vector.broadcast %c4_i32_45 : i32 to vector<8x32xi32>
    %89 = arith.muli %56, %88 : vector<8x32xi32>
    %c3_i32 = arith.constant 3 : i32
    %90 = vector.broadcast %c3_i32 : i32 to vector<8x32xi32>
    %91 = arith.addi %89, %90 : vector<8x32xi32>
    %92 = arith.cmpi eq, %57, %91 : vector<8x32xi32>
    %cst_46 = arith.constant 1.000000e+00 : f32
    %cst_47 = arith.constant 0.000000e+00 : f32
    %93 = vector.broadcast %cst_46 : f32 to vector<8x32xf32>
    %94 = vector.broadcast %cst_47 : f32 to vector<8x32xf32>
    %95 = arith.select %92, %93, %94 : vector<8x32xi1>, vector<8x32xf32>
    %96 = arith.truncf %95 : vector<8x32xf32> to vector<8x32xbf16>
    %cst_48 = arith.constant dense<0.000000e+00> : vector<8x8xf32>
    %97 = tpu.matmul %96, %55, %cst_48 {dimension_numbers = #tpu.dot_dimension_numbers<[1], [0], [0], [1], [0, 0, 1, 1], [], []>} : vector<8x32xbf16>, vector<32x8xbf16>, vector<8x8xf32> -> vector<8x8xf32>
    %98 = tpu.concatenate %67, %77, %87, %97 in 1 : vector<8x8xf32>, vector<8x8xf32>, vector<8x8xf32>, vector<8x8xf32> -> vector<8x32xf32>
    %99 = arith.truncf %98 : vector<8x32xf32> to vector<8x32xbf16>
    %c0_49 = arith.constant 0 : index
    %c0_50 = arith.constant 0 : index
    %100 = vector.load %arg9[%c0_49, %c0_50] : memref<32x32xbf16, #tpu.memory_space<vmem>>, vector<32x32xbf16>
    %cst_51 = arith.constant dense<0.000000e+00> : vector<8x32xf32>
    %101 = tpu.matmul %99, %100, %cst_51 {dimension_numbers = #tpu.dot_dimension_numbers<[1], [0], [0], [1], [0, 0, 1, 1], [], []>} : vector<8x32xbf16>, vector<32x32xbf16>, vector<8x32xf32> -> vector<8x32xf32>
    %c0_52 = arith.constant 0 : index
    %c0_53 = arith.constant 0 : index
    %102 = vector.load %arg10[%c0_52, %c0_53] : memref<1x32xf32, #tpu.memory_space<vmem>>, vector<1x32xf32>
    %103 = vector.broadcast %102 : vector<1x32xf32> to vector<8x32xf32>
    %104 = arith.addf %101, %103 : vector<8x32xf32>
    %105 = arith.addf %1, %104 : vector<8x32xf32>
    %c0_54 = arith.constant 0 : index
    %c0_55 = arith.constant 0 : index
    %106 = vector.load %arg11[%c0_54, %c0_55] : memref<1x32xf32, #tpu.memory_space<vmem>>, vector<1x32xf32>
    %c0_56 = arith.constant 0 : index
    %c0_57 = arith.constant 0 : index
    %107 = vector.load %arg12[%c0_56, %c0_57] : memref<1x32xf32, #tpu.memory_space<vmem>>, vector<1x32xf32>
    %cst_58 = arith.constant dense<0.000000e+00> : vector<8xf32>
    %108 = vector.multi_reduction <add>, %105, %cst_58 [1] : vector<8x32xf32> to vector<8xf32>
    %109 = vector.shape_cast %108 : vector<8xf32> to vector<8x1xf32>
    %cst_59 = arith.constant 3.200000e+01 : f32
    %110 = vector.broadcast %cst_59 : f32 to vector<8x1xf32>
    %111 = arith.divf %109, %110 : vector<8x1xf32>
    %112 = vector.broadcast %111 : vector<8x1xf32> to vector<8x32xf32>
    %113 = arith.subf %105, %112 : vector<8x32xf32>
    %114 = arith.mulf %113, %113 : vector<8x32xf32>
    %cst_60 = arith.constant dense<0.000000e+00> : vector<8xf32>
    %115 = vector.multi_reduction <add>, %114, %cst_60 [1] : vector<8x32xf32> to vector<8xf32>
    %116 = vector.shape_cast %115 : vector<8xf32> to vector<8x1xf32>
    %cst_61 = arith.constant 3.200000e+01 : f32
    %117 = vector.broadcast %cst_61 : f32 to vector<8x1xf32>
    %118 = arith.divf %116, %117 : vector<8x1xf32>
    %119 = vector.broadcast %111 : vector<8x1xf32> to vector<8x32xf32>
    %120 = arith.subf %105, %119 : vector<8x32xf32>
    %cst_62 = arith.constant 9.99999974E-6 : f32
    %121 = vector.broadcast %cst_62 : f32 to vector<8x1xf32>
    %122 = arith.addf %118, %121 : vector<8x1xf32>
    %123 = math.rsqrt %122 : vector<8x1xf32>
    %124 = vector.broadcast %123 : vector<8x1xf32> to vector<8x32xf32>
    %125 = arith.mulf %120, %124 : vector<8x32xf32>
    %126 = vector.broadcast %106 : vector<1x32xf32> to vector<8x32xf32>
    %127 = arith.mulf %125, %126 : vector<8x32xf32>
    %128 = vector.broadcast %107 : vector<1x32xf32> to vector<8x32xf32>
    %129 = arith.addf %127, %128 : vector<8x32xf32>
    %c0_63 = arith.constant 0 : index
    %c0_64 = arith.constant 0 : index
    %c0_65 = arith.constant 0 : index
    %130 = vector.load %arg13[%c0_63, %c0_64, %c0_65] : memref<1x8x32xf32, #tpu.memory_space<vmem>>, vector<1x8x32xf32>
    %131 = vector.shape_cast %130 : vector<1x8x32xf32> to vector<8x32xf32>
    %132 = vector.shape_cast %129 : vector<8x32xf32> to vector<1x8x32xf32>
    tpu.vector_store %arg13[%c0_63, %c0_64, %c0_65], %132 {strides = array<i32>} : memref<1x8x32xf32, #tpu.memory_space<vmem>>, vector<1x8x32xf32>,
    return
  }
  func.func @transform_0(%arg0: i32) -> (i32, i32, i32) {
    %c0_i32 = arith.constant 0 : i32
    %c0_i32_0 = arith.constant 0 : i32
    %c0_i32_1 = arith.constant 0 : i32
    return %arg0, %c0_i32, %c0_i32_0 : i32, i32, i32
  }
  func.func @transform_1(%arg0: i32) -> (i32, i32, i32) {
    %c0_i32 = arith.constant 0 : i32
    %c0_i32_0 = arith.constant 0 : i32
    %c0_i32_1 = arith.constant 0 : i32
    return %arg0, %c0_i32, %c0_i32_0 : i32, i32, i32
  }
  func.func @transform_2(%arg0: i32) -> (i32, i32, i32) {
    %c0_i32 = arith.constant 0 : i32
    %c0_i32_0 = arith.constant 0 : i32
    %c0_i32_1 = arith.constant 0 : i32
    %c0_i32_2 = arith.constant 0 : i32
    return %c0_i32, %c0_i32_0, %c0_i32_1 : i32, i32, i32
  }
  func.func @transform_3(%arg0: i32) -> (i32, i32, i32) {
    %c0_i32 = arith.constant 0 : i32
    %c0_i32_0 = arith.constant 0 : i32
    %c0_i32_1 = arith.constant 0 : i32
    %c0_i32_2 = arith.constant 0 : i32
    return %c0_i32, %c0_i32_0, %c0_i32_1 : i32, i32, i32
  }
  func.func @transform_4(%arg0: i32) -> (i32, i32, i32) {
    %c0_i32 = arith.constant 0 : i32
    %c0_i32_0 = arith.constant 0 : i32
    %c0_i32_1 = arith.constant 0 : i32
    %c0_i32_2 = arith.constant 0 : i32
    return %c0_i32, %c0_i32_0, %c0_i32_1 : i32, i32, i32
  }
  func.func @transform_5(%arg0: i32) -> (i32, i32, i32) {
    %c0_i32 = arith.constant 0 : i32
    %c0_i32_0 = arith.constant 0 : i32
    %c0_i32_1 = arith.constant 0 : i32
    %c0_i32_2 = arith.constant 0 : i32
    return %c0_i32, %c0_i32_0, %c0_i32_1 : i32, i32, i32
  }
  func.func @transform_6(%arg0: i32) -> (i32, i32, i32) {
    %c0_i32 = arith.constant 0 : i32
    %c0_i32_0 = arith.constant 0 : i32
    %c0_i32_1 = arith.constant 0 : i32
    %c0_i32_2 = arith.constant 0 : i32
    return %c0_i32, %c0_i32_0, %c0_i32_1 : i32, i32, i32
  }
  func.func @transform_7(%arg0: i32) -> (i32, i32, i32) {
    %c0_i32 = arith.constant 0 : i32
    %c0_i32_0 = arith.constant 0 : i32
    %c0_i32_1 = arith.constant 0 : i32
    %c0_i32_2 = arith.constant 0 : i32
    return %c0_i32, %c0_i32_0, %c0_i32_1 : i32, i32, i32
  }
  func.func @transform_8(%arg0: i32) -> (i32, i32) {
    %c0_i32 = arith.constant 0 : i32
    %c0_i32_0 = arith.constant 0 : i32
    %c0_i32_1 = arith.constant 0 : i32
    return %c0_i32, %c0_i32_0 : i32, i32
  }
  func.func @transform_9(%arg0: i32) -> (i32, i32) {
    %c0_i32 = arith.constant 0 : i32
    %c0_i32_0 = arith.constant 0 : i32
    %c0_i32_1 = arith.constant 0 : i32
    return %c0_i32, %c0_i32_0 : i32, i32
  }
  func.func @transform_10(%arg0: i32) -> (i32, i32) {
    %c0_i32 = arith.constant 0 : i32
    %c0_i32_0 = arith.constant 0 : i32
    %c0_i32_1 = arith.constant 0 : i32
    return %c0_i32, %c0_i32_0 : i32, i32
  }
  func.func @transform_11(%arg0: i32) -> (i32, i32) {
    %c0_i32 = arith.constant 0 : i32
    %c0_i32_0 = arith.constant 0 : i32
    %c0_i32_1 = arith.constant 0 : i32
    return %c0_i32, %c0_i32_0 : i32, i32
  }
  func.func @transform_12(%arg0: i32) -> (i32, i32, i32) {
    %c0_i32 = arith.constant 0 : i32
    %c0_i32_0 = arith.constant 0 : i32
    %c0_i32_1 = arith.constant 0 : i32
    return %arg0, %c0_i32, %c0_i32_0 : i32, i32, i32
  }
  func.func @transform_13(%arg0: i32) -> (i32, i32, i32, i32) {
    %c0_i32 = arith.constant 0 : i32
    %c0_i32_0 = arith.constant 0 : i32
    %c0_i32_1 = arith.constant 0 : i32
    %c0_i32_2 = arith.constant 0 : i32
    return %arg0, %c0_i32, %c0_i32_0, %c0_i32_1 : i32, i32, i32, i32
  }
}

</mosaic_0001>

<bundles_post_ra>
// kernel: decoder_layer_forward.5
= control target key start
LH: loop header
LB: loop body
LE: loop exit
PB: predicated region body
PF: predicated region fallthrough
CT: control target
= control target key end

     0   :  { %12 = vsyncpa [#allocation3], 0  ;;  %s1545_s0 = inlined_call_operand.hbm [shape: f32[16,32], index: 0, kind: input, shape index: {}]   ;;  %s1546_s1 = inlined_call_operand.hbm [shape: bf16[32,64], index: 1, kind: input, shape index: {}]   ;;  %s1547_s2 = inlined_call_operand.hbm [shape: f32[1,64], index: 2, kind: input, shape index: {}]   ;;  %s1548_s3 = inlined_call_operand.hbm [shape: bf16[64,32], index: 3, kind: input, shape index: {}]   ;;  %s1549_s4 = inlined_call_operand.hbm [shape: f32[1,32], index: 4, kind: input, shape index: {}]   ;;  %s1550_s5 = inlined_call_operand.hbm [shape: f32[1,32], index: 5, kind: input, shape index: {}]   ;;  %s1551_s6 = inlined_call_operand.hbm [shape: f32[1,32], index: 6, kind: input, shape index: {}]   ;;  %s1552_s7 = inlined_call_operand.hbm [shape: f32[16,32], index: 7, kind: output, shape index: {}]  }
   0x1   :  { %14 = vsyncpa [#allocation3 + $0x1], 0 }
   0x2   :  { %15 = vsyncpa [#allocation6], 0 }
   0x3   :  { %16 = vsyncpa [#allocation9], 0 }
   0x4   :  { %17 = vsyncpa [#allocation12], 0 }
   0x5   :  { %18 = vsyncpa [#allocation4], 0 }
   0x6   :  { %20 = vsyncpa [#allocation4 + $0x1], 0  ;;  %s1216_s24 = smov 0   ;;  %s1218_s25 = smov 0  }
   0x7   :  { %s1220_s26 = smov 0   ;;  %s1222_s27 = smov 0  }
   0x8 LB: > { %s1164_s28 = smov [#allocation5]   ;;  %s1237_s30 = sadd.s32 4294967295, %s1162_s27   ;;  %s1162_s27 = sphi %s1222_s27, %s1578_s27   ;;  %s1158_s26 = sphi %s1220_s26, %s1577_s26   ;;  %s1154_s25 = sphi %s1218_s25, %s1576_s25   ;;  %s1150_s24 = sphi %s1216_s24, %s1575_s24  }
   0x9   : > { %s221_s29 = sshll.u32 %s1164_s28, 4  ;;  %p702_p0 = scmp.ge.s32.totalorder %s1162_s27, 1  ;;  %s1242_s29 = int_to_ptr.vmem [resolvable:$true] %s221_s29 }
   0xa   : > { %p1553_p1 = scmp.eq.s32.totalorder %s1237_s30, 0  ;;  %p209_p2 = scmp.lt.s32.totalorder %s1162_s27, 3 }
   0xb   : > { %s1165_s9 = smov [#allocation8]   ;;  %s1166_s12 = smov [#allocation11]  }
   0xc   : > { %p1244_p3 = pnand %p702_p0, %p209_p2  ;;  %s245_s10 = sshll.u32 %s1165_s9, 4  ;;  %s1257_s10 = int_to_ptr.vmem [resolvable:$true] %s245_s10 }
   0xd   : > { %s270_s13 = sshll.u32 %s1166_s12, 4  ;;  %s886_s16 = scalar_lea.hbm %s1546_s1, 256  ;;  %s1259_s13 = int_to_ptr.vmem [resolvable:$true] %s270_s13 }
   0xe   : > { %s1556_s8 = scalar_select %p1244_p3, 1, 0 }
   0xf   : > { %p793_p5 = pneg %p1244_p3  ;;  %p887_p7 = scmp.ne.s32.totalorder %s1546_s1, %s886_s16 }
  0x10   : > { %p893_p11 = scmp.lt.u32.totalorder %s886_s16, %s1546_s1 }
  0x11   : > { %p1253_p6 = pnand %p793_p5, %p1553_p1 }
  0x13   : > { %p1269_p8 = pneg %p1253_p6 }
  0x15   : > { %p889_p9 = pnand %p1269_p8, %p887_p7 }
  0x17   : > { %p890_p10 = pneg %p889_p9 }
  0x19   : > { %p895_p12 = pnand %p893_p11, %p890_p10 }
  0x1b   : > { %898 = shalt.err (!%p895_p12)
}
  0x1c   : > { %s899_s22 = scalar_lea.vmem %s1242_s29, 256  ;;  %p907_p5 = scmp.lt.s32.totalorder %s1242_s29, %s1242_s29 }
  0x1d   : > { %p900_p13 = scmp.ne.s32.totalorder %s1242_s29, %s899_s22  ;;  %p908_p4 = scmp.lt.s32.totalorder %s899_s22, %s899_s22 }
  0x1f   : > { %p902_p0 = pnand %p900_p13, %p1269_p8  ;;  %p909_p7 = por %p908_p4, %p907_p5 }
  0x21   : > { %p903_p2 = pneg %p902_p0 }
  0x23   : > { %p910_p9 = pnand %p909_p7, %p903_p2 }
  0x25   : > { %913 = shalt.err (!%p910_p9)
}
  0x26   : > { %s1167_s23 = smov 64   ;;  %s1168_s28 = smov 4  }
  0x27   : > { %796 = dma.hbm_to_vmem [thread:$0]  (!%p1253_p6), %s1546_s1, 256, %s1242_s29, [#allocation6], %s1167_s23, %s1167_s23, %s1168_s28  }
  0x28   : > { %s914_s16 = scalar_lea.hbm %s1548_s3, 512 }
  0x29   : > { %p915_p4 = scmp.ne.s32.totalorder %s1548_s3, %s914_s16  ;;  %p921_p12 = scmp.lt.u32.totalorder %s914_s16, %s1548_s3 }
  0x2b   : > { %p917_p10 = pnand %p915_p4, %p1269_p8 }
  0x2d   : > { %p918_p11 = pneg %p917_p10 }
  0x2f   : > { %p923_p13 = pnand %p921_p12, %p918_p11 }
  0x31   : > { %926 = shalt.err (!%p923_p13)
}
  0x32   : > { %s927_s29 = scalar_lea.vmem %s1257_s10, 512  ;;  %p935_p7 = scmp.lt.s32.totalorder %s1257_s10, %s1257_s10 }
  0x33   : > { %p928_p0 = scmp.ne.s32.totalorder %s1257_s10, %s927_s29  ;;  %p936_p9 = scmp.lt.s32.totalorder %s927_s29, %s927_s29 }
  0x35   : > { %p930_p2 = pnand %p928_p0, %p1269_p8  ;;  %p937_p4 = por %p936_p9, %p935_p7 }
  0x37   : > { %p931_p5 = pneg %p930_p2 }
  0x39   : > { %p938_p10 = pnand %p937_p4, %p931_p5 }
  0x3b   : > { %941 = shalt.err (!%p938_p10)
}
  0x3c   : > { %802 = dma.hbm_to_vmem [thread:$0]  (!%p1253_p6), %s1548_s3, 512, %s1257_s10, [#allocation9], %s1167_s23, %s1167_s23, %s1168_s28  }
  0x3d   : > { %s942_s15 = scalar_lea.hbm %s1550_s5, 16 }
  0x3e   : > { %p943_p11 = scmp.ne.s32.totalorder %s1550_s5, %s942_s15  ;;  %p949_p0 = scmp.lt.u32.totalorder %s942_s15, %s1550_s5 }
  0x40   : > { %p945_p12 = pnand %p943_p11, %p1269_p8 }
  0x42   : > { %p946_p13 = pneg %p945_p12 }
  0x44   : > { %p951_p2 = pnand %p949_p0, %p946_p13 }
  0x46   : > { %954 = shalt.err (!%p951_p2)
}
  0x47   : > { %s955_s10 = scalar_lea.vmem %s1259_s13, 16  ;;  %s962_s23 = scalar_lea.vmem %s1259_s13, 32 }
  0x48   : > { %p956_p5 = scmp.ne.s32.totalorder %s1259_s13, %s955_s10  ;;  %p963_p4 = scmp.lt.s32.totalorder %s1259_s13, %s1259_s13 }
  0x49   : > { %p964_p10 = scmp.lt.s32.totalorder %s962_s23, %s955_s10 }
  0x4a   : > { %p958_p7 = pnand %p956_p5, %p1269_p8 }
  0x4b   : > { %p965_p11 = por %p964_p10, %p963_p4 }
  0x4c   : > { %p959_p9 = pneg %p958_p7 }
  0x4e   : > { %p966_p12 = pnand %p965_p11, %p959_p9 }
  0x50   : > { %969 = shalt.err (!%p966_p12)
}
  0x51   : > { %808 = dma.hbm_to_vmem [thread:$0]  (!%p1253_p6), %s1550_s5, 16, %s1259_s13, [#allocation12]  }
  0x52   : > { %s1169_s29 = smov [#allocation7]   ;;  %s1170_s9 = smov [#allocation10]  }
  0x53   : > { %s235_s22 = sshll.u32 %s1169_s29, 4  ;;  %s259_s12 = sshll.u32 %s1170_s9, 4  ;;  %s236_s22 = int_to_ptr.vmem [resolvable:$true] %s235_s22  ;;  %s260_s12 = int_to_ptr.vmem [resolvable:$true] %s259_s12 }
  0x54   : > { %s970_s16 = scalar_lea.hbm %s1547_s2, 16 }
  0x55   : > { %p971_p13 = scmp.ne.s32.totalorder %s1547_s2, %s970_s16  ;;  %p977_p5 = scmp.lt.u32.totalorder %s970_s16, %s1547_s2 }
  0x57   : > { %p973_p0 = pnand %p971_p13, %p1269_p8 }
  0x59   : > { %p974_p2 = pneg %p973_p0 }
  0x5b   : > { %p979_p7 = pnand %p977_p5, %p974_p2 }
  0x5d   : > { %982 = shalt.err (!%p979_p7)
}
  0x5e   : > { %s983_s13 = scalar_lea.vmem %s236_s22, 16  ;;  %s990_s23 = scalar_lea.vmem %s236_s22, 32 }
  0x5f   : > { %p984_p9 = scmp.ne.s32.totalorder %s236_s22, %s983_s13  ;;  %p991_p11 = scmp.lt.s32.totalorder %s236_s22, %s236_s22 }
  0x60   : > { %p992_p12 = scmp.lt.s32.totalorder %s990_s23, %s983_s13 }
  0x61   : > { %p986_p4 = pnand %p984_p9, %p1269_p8 }
  0x62   : > { %p993_p1 = por %p992_p12, %p991_p11 }
  0x63   : > { %p987_p10 = pneg %p986_p4 }
  0x65   : > { %p994_p3 = pnand %p993_p1, %p987_p10 }
  0x67   : > { %997 = shalt.err (!%p994_p3)
}
  0x68   : > { %799 = dma.hbm_to_vmem [thread:$0]  (!%p1253_p6), %s1547_s2, 16, %s236_s22, [#allocation6]  }
  0x69   : > { %s998_s14 = scalar_lea.hbm %s1549_s4, 16 }
  0x6a   : > { %p999_p13 = scmp.ne.s32.totalorder %s1549_s4, %s998_s14  ;;  %p1005_p3 = scmp.lt.u32.totalorder %s998_s14, %s1549_s4 }
  0x6c   : > { %p1001_p0 = pnand %p999_p13, %p1269_p8 }
  0x6e   : > { %p1002_p1 = pneg %p1001_p0 }
  0x70   : > { %p1007_p2 = pnand %p1005_p3, %p1002_p1 }
  0x72   : > { %1010 = shalt.err (!%p1007_p2)
}
  0x73   : > { %s1011_s20 = scalar_lea.vmem %s260_s12, 16  ;;  %s1018_s22 = scalar_lea.vmem %s260_s12, 32 }
  0x74   : > { %p1012_p5 = scmp.ne.s32.totalorder %s260_s12, %s1011_s20  ;;  %p1019_p4 = scmp.lt.s32.totalorder %s260_s12, %s260_s12 }
  0x75   : > { %p1020_p10 = scmp.lt.s32.totalorder %s1018_s22, %s1011_s20 }
  0x76   : > { %p1014_p7 = pnand %p1012_p5, %p1269_p8 }
  0x77   : > { %p1021_p11 = por %p1020_p10, %p1019_p4 }
  0x78   : > { %p1015_p9 = pneg %p1014_p7 }
  0x7a   : > { %p1022_p12 = pnand %p1021_p11, %p1015_p9 }
  0x7c   : > { %1025 = shalt.err (!%p1022_p12)
}
  0x7d   : > { %805 = dma.hbm_to_vmem [thread:$0]  (!%p1253_p6), %s1549_s4, 16, %s260_s12, [#allocation9]  }
  0x7e   : > { %s1171_s23 = smov [#allocation13]   ;;  %s1026_s9 = scalar_lea.hbm %s1551_s6, 16 }
  0x7f   : > { %s281_s28 = sshll.u32 %s1171_s23, 4  ;;  %p1027_p13 = scmp.ne.s32.totalorder %s1551_s6, %s1026_s9  ;;  %s282_s28 = int_to_ptr.vmem [resolvable:$true] %s281_s28 }
  0x80   : > { %p1033_p3 = scmp.lt.u32.totalorder %s1026_s9, %s1551_s6 }
  0x81   : > { %p1029_p0 = pnand %p1027_p13, %p1269_p8 }
  0x83   : > { %p1030_p1 = pneg %p1029_p0 }
  0x85   : > { %p1035_p2 = pnand %p1033_p3, %p1030_p1 }
  0x87   : > { %1038 = shalt.err (!%p1035_p2)
}
  0x88   : > { %s1039_s12 = scalar_lea.vmem %s282_s28, 16  ;;  %s1046_s18 = scalar_lea.vmem %s282_s28, 32 }
  0x89   : > { %p1040_p5 = scmp.ne.s32.totalorder %s282_s28, %s1039_s12  ;;  %p1047_p4 = scmp.lt.s32.totalorder %s282_s28, %s282_s28 }
  0x8a   : > { %p1048_p10 = scmp.lt.s32.totalorder %s1046_s18, %s1039_s12 }
  0x8b   : > { %p1042_p7 = pnand %p1040_p5, %p1269_p8 }
  0x8c   : > { %p1049_p11 = por %p1048_p10, %p1047_p4 }
  0x8d   : > { %p1043_p9 = pneg %p1042_p7 }
  0x8f   : > { %p1050_p12 = pnand %p1049_p11, %p1043_p9 }
  0x91   : > { %1053 = shalt.err (!%p1050_p12)
}
  0x92   : > { %811 = dma.hbm_to_vmem [thread:$0]  (!%p1253_p6), %s1551_s6, 16, %s282_s28, [#allocation12]  }
  0x93   : > { %s701_s19 = sadd.s32 4294967294, %s1162_s27   ;;  %s1393_s11 = sadd.s32 1, %s1162_s27  }
  0x94   : > { %s30_s10 = ssub.s32 %s1162_s27, %s1393_s11  ;;  %s33_s13 = sadd.s32 1, %s1158_s26 }
  0x95   : > { %p31_p8 = scmp.eq.s32.totalorder %s30_s10, 0  ;;  %p40_p13 = scmp.ne.s32.totalorder %s1158_s26, %s1154_s25 }
  0x96   : > { %p41_p0 = scmp.eq.s32.totalorder %s1162_s27, 0  ;;  %p46_p1 = scmp.ne.s32.totalorder %s1154_s25, %s1150_s24 }
  0x97   : > { %s1404_s23 = scalar_select %p31_p8, %s1158_s26, %s33_s13  }
  0x98   : > { %p1406_p3 = por %p41_p0, %p40_p13  ;;  %p1560_p2 = scmp.eq.s32.totalorder %s1237_s30, 0 }
  0x99   : > { %p196_p5 = scmp.eq.s32.totalorder %s1237_s30, 1  ;;  %p202_p7 = scmp.eq.s32.totalorder %s701_s19, 1 }
  0x9a   : > { %p1412_p6 = por %p1560_p2, %p46_p1  ;;  %p826_p9 = scmp.lt.s32.totalorder %s1162_s27, 2 }
  0x9b   : > { %s292_s29 = sand.u32 1, %s1158_s26   ;;  %p1419_p4 = por %p196_p5, %p40_p13 }
  0x9c   : > { %p1423_p10 = por %p202_p7, %p46_p1  ;;  %s710_s15 = sshll.u32 %s292_s29, 3 }
  0x9d   : > { %s1562_s9 = scalar_select %p1419_p4, 1, 0 }
  0x9e   : > { %s1563_s14 = scalar_select %p1423_p10, 1, 0 }
  0x9f   : > { %s711_s16 = sshll.u32 %s1162_s27, 7  ;;  %s296_s20 = scalar_lea.vmem [#allocation2], %s710_s15 }
  0xa0   : > { %s1431_s18 = scalar_lea.hbm %s1545_s0, %s711_s16  ;;  %s303_s22 = sshll.u32 %s296_s20, 4  ;;  %s1433_s22 = int_to_ptr.vmem [resolvable:$true] %s303_s22 }
  0xa1   : > { %p1437_p11 = pnand %p826_p9, %p1406_p3  ;;  %s293_s10 = scalar_lea.sflag [#allocation3], %s292_s29 }
  0xa2   : > { %s1054_s13 = scalar_lea.hbm %s1431_s18, 128  ;;  %s1059_s17 = scalar_lea.hbm %s1545_s0, 256 }
  0xa3   : > { %p1055_p12 = scmp.ne.s32.totalorder %s1431_s18, %s1054_s13  ;;  %p1056_p8 = pneg %p1437_p11 }
  0xa4   : > { %p1060_p1 = scmp.lt.u32.totalorder %s1431_s18, %s1545_s0  ;;  %p1061_p3 = scmp.lt.u32.totalorder %s1059_s17, %s1054_s13 }
  0xa5   : > { %p1057_p13 = pnand %p1056_p8, %p1055_p12  ;;  %p1063_p5 = scmp.lt.u32.totalorder %s1054_s13, %s1431_s18 }
  0xa6   : > { %p1062_p2 = por %p1061_p3, %p1060_p1 }
  0xa7   : > { %p1058_p0 = pneg %p1057_p13 }
  0xa8   : > { %p1064_p7 = por %p1063_p5, %p1062_p2 }
  0xaa   : > { %p1065_p9 = pnand %p1064_p7, %p1058_p0 }
  0xac   : > { %1068 = shalt.err (!%p1065_p9)
}
  0xad   : > { %s1069_s29 = scalar_lea.vmem %s1433_s22, 128  ;;  %s1172_s20 = smov [#allocation2]  }
  0xae   : > { %p1070_p12 = scmp.ne.s32.totalorder %s1433_s22, %s1069_s29  ;;  %s1074_s15 = sshll.u32 %s1172_s20, 4  ;;  %s1075_s15 = int_to_ptr.vmem [resolvable:$false] %s1074_s15 }
  0xaf   : > { %s1076_s16 = scalar_lea.vmem %s1075_s15, 256  ;;  %p1077_p4 = scmp.lt.s32.totalorder %s1433_s22, %s1075_s15 }
  0xb0   : > { %p1072_p13 = pnand %p1070_p12, %p1056_p8  ;;  %p1078_p1 = scmp.lt.s32.totalorder %s1076_s16, %s1069_s29 }
  0xb2   : > { %p1073_p10 = pneg %p1072_p13  ;;  %p1079_p3 = por %p1078_p1, %p1077_p4 }
  0xb4   : > { %p1080_p2 = pnand %p1079_p3, %p1073_p10 }
  0xb6   : > { %1083 = shalt.err (!%p1080_p2)
}
  0xb7   : > { %815 = dma.hbm_to_vmem [thread:$0]  (!%p1437_p11), %s1431_s18, 128, %s1433_s22, %s293_s10  }
  0xb8   : > { %p1565_p0 = scmp.ne.s32.totalorder %s1556_s8, 0 }
  0xb9   : > { %s1469_s13 = sand.u32 (!%p1565_p0), 1, %s1154_s25  }
  0xba   : > { %312 = sbr.rel (%p1565_p0) target bundleno = 983 (0x3d7), region = 48  ;;  %s713_s17 = sshll.u32 (!%p1565_p0), %s1469_s13, 3 }
  0xbb   : > { %s315_s21 = scalar_lea.sflag (!%p1565_p0), [#allocation3], %s1469_s13  ;;  %s318_s12 = scalar_lea.vmem (!%p1565_p0), [#allocation2], %s713_s17 }
  0xc1   : > { %1129 = dma.done.wait (%p1412_p6), %s315_s21, 128  }
  0xc2   : > { %1131 = vsyncadd (%p1412_p6), %s315_s21, 4294967168  ;;  %p1566_p4 = scmp.eq.s32.totalorder %s1237_s30, 0 }
  0xc4   : > { %1133 = dma.done.wait (%p1566_p4), [#allocation6], 272   ;;  %p1567_p10 = pmov %p1566_p4 }
  0xc5   : > { %p1568_p11 = pmov %p1566_p4 }
  0xc6   : > { %1135 = vsyncadd (%p1567_p10), [#allocation6], 4294967024 }
  0xc7   : > { %1137 = dma.done.wait (%p1568_p11), [#allocation9], 528   ;;  %p1569_p8 = pmov %p1566_p4 }
  0xc8   : > { %p1570_p5 = pmov %p1566_p4 }
  0xc9   : > { %1139 = vsyncadd (%p1569_p8), [#allocation9], 4294966768 }
  0xca   : > { %1141 = dma.done.wait (%p1570_p5), [#allocation12], 32   ;;  %p1571_p7 = pmov %p1566_p4 }
  0xcb   : > { %v1173_v0 = vmov 0.0   ;;  %vm1174_vm0 = vmmov 0   ;;  %v876_v1 = vld [vmem:[#allocation5] sm:$0xff]   ;;  %v877_v2 = vld [vmem:[#allocation5 + $0x8] sm:$0xff]   ;;  %v374_v3 = vld [vmem:[%s318_s12] sm:$0xff]  ;;  %vm399_vm1 = vcmask 261120  }
  0xcc   : > { %1143 = vsyncadd (%p1571_p7), [#allocation12], 4294967264  ;;  %745 = vmatprep.subr.bf16.mxu0 %v1173_v0  ;;  %749 = vmatprep.mubr.msk.bf16.mxu0 %vm1174_vm0, %v1173_v0  ;;  %v375_v4 = vpack.c.bf16 %v374_v3, %v374_v3  ;;  %v878_v5 = vld [vmem:[#allocation8] sm:$0xff]   ;;  %v879_v6 = vld [vmem:[#allocation8 + $0x8] sm:$0xff]   ;;  %vm484_vm2 = vcmask 523264   ;;  %s734_s8 = sshll.u32 %s1237_s30, 7 }
  0xcd   : > { %753 = vmatprep.subr.bf16.mxu1 %v1173_v0  ;;  %761 = vmatprep.mubr.msk.bf16.mxu1 %vm1174_vm0, %v1173_v0  ;;  %v880_v7 = vld [vmem:[#allocation8 + $0x10] sm:$0xff]   ;;  %v881_v8 = vld [vmem:[#allocation8 + $0x18] sm:$0xff]   ;;  %v725_v17 = vld [vmem:[#allocation10] ss:$0 sm:$0xff]  ;;  %s372_s28 = scalar_lea.vmem [#allocation14], %s713_s17  ;;  %s1500_s10 = scalar_lea.hbm %s1552_s7, %s734_s8 }
  0xce   : > { %746 = vmatpush3.bf16.msra.mxu0 %v876_v1  ;;  %754 = vmatpush3.bf16.msra.mxu1 %v878_v5  ;;  %v721_v9 = vld [vmem:[#allocation7] ss:$0 sm:$0xff]  ;;  %v731_v34 = vld [vmem:[#allocation11] ss:$0 sm:$0xff]  ;;  %v732_v36 = vld [vmem:[#allocation13] ss:$0 sm:$0xff] }
  0xcf   : > { %747 = vmatprep.subr.bf16.mxu0 %v1173_v0  ;;  %755 = vmatprep.subr.bf16.mxu1 %v1173_v0  ;;  %s574_s18 = sshll.u32 %s372_s28, 4  ;;  %s561_s29 = scalar_lea.sflag [#allocation4], %s1469_s13  ;;  %s1502_s18 = int_to_ptr.vmem [resolvable:$true] %s574_s18 }
  0xd0   : > { %s1084_s20 = scalar_lea.vmem %s1502_s18, 128  ;;  %p1572_p9 = scmp.ne.s32.totalorder %s1562_s9, 0 }
  0xd1   : > { %p1085_p6 = scmp.ne.s32.totalorder %s1502_s18, %s1084_s20  ;;  %s1175_s30 = smov [#allocation14]  }
  0xd2   : > { %748 = vmatpush3.bf16.msra.mxu0 %v877_v2  ;;  %756 = vmatpush3.bf16.msra.mxu1 %v879_v6  ;;  %s1088_s15 = sshll.u32 %s1175_s30, 4  ;;  %s1089_s15 = int_to_ptr.vmem [resolvable:$false] %s1088_s15 }
  0xd3   : > { %757 = vmatprep.subr.bf16.mxu1 %v1173_v0  ;;  %p1086_p12 = pnand %p1085_p6, %p1572_p9  ;;  %s1090_s16 = scalar_lea.vmem %s1089_s15, 256 }
  0xd4   : > { %p1091_p1 = scmp.lt.s32.totalorder %s1502_s18, %s1089_s15  ;;  %p1092_p3 = scmp.lt.s32.totalorder %s1090_s16, %s1084_s20 }
  0xd5   : > { %750 = vmatmul.mubr.msk.bf16.vlgmr.msra.gmra.mrb[0].mxu0 %vm399_vm1, %v375_v4  ;;  %p1087_p13 = pneg %p1086_p12 }
  0xd6   : > { %758 = vmatpush3.bf16.msra.mxu1 %v880_v7  ;;  %p1093_p2 = por %p1092_p3, %p1091_p1 }
  0xd7   : > { %759 = vmatprep.subr.bf16.mxu1 %v1173_v0 }
  0xd8   : > { %p1094_p0 = pnand %p1093_p2, %p1087_p13 }
  0xda   : > { %760 = vmatpush3.bf16.msra.mxu1 %v881_v8 }
 0x1a8   : > { %v437_v10 = vpop.f32.mrb[0].mxu0 }
 0x1a9   : > { %v438_v11 = vadd.f32 %v721_v9, %v437_v10  ;;  %v751_v12 = vpop.f32.mrb[1].mxu0 }
 0x1aa   : > { %v440_v13 = vpop.f32.mrb[2].mxu0 }
 0x1ab   : > { %882 = vtanh.f32 %v438_v11  ;;  %v752_v14 = vpop.f32.mrb[3].mxu0 }
 0x1b5   : > { %v883_v15 = vpop.eup %882 }
 0x1b6   : > { %v444_v16 = vpack.c.bf16 %v883_v15, %v883_v15 }
 0x1b8   : > { %762 = vmatmul.mubr.msk.bf16.vlgmr.msra.gmra.mrb[0].mxu1 %vm484_vm2, %v444_v16 }
 0x28b   : > { %v522_v18 = vpop.f32.mrb[0].mxu1 }
 0x28c   : > { %v523_v19 = vadd.f32 %v725_v17, %v522_v18  ;;  %v763_v20 = vpop.f32.mrb[1].mxu1 }
 0x28d   : > { %v525_v21 = vpop.f32.mrb[2].mxu1 }
 0x28e   : > { %v764_v22 = vpop.f32.mrb[3].mxu1  ;;  %v528_v23 = vadd.f32 %v523_v19, %v374_v3 }
 0x290   : > { %v531_v24 = vsel %vm399_vm1, %v528_v23, 0.0 }
 0x291   : > { %532 = vadd.xlane.f32.xlu0 %v531_v24 }
 0x31e   : > { %v533_v25 = vpop.xlane.xlu0 %532 }
 0x31f   : > { %v535_v26 = vmul.f32 0.03125, %v533_v25 }
 0x321   : > { %v536_v27 = vsub.f32 %v528_v23, %v535_v26 }
 0x323   : > { %v537_v28 = vmul.f32 %v536_v27, %v536_v27 }
 0x325   : > { %v538_v29 = vsel %vm399_vm1, %v537_v28, 0.0 }
 0x326   : > { %539 = vadd.xlane.f32.xlu0 %v538_v29 }
 0x3b3   : > { %v540_v30 = vpop.xlane.xlu0 %539 }
 0x3b4   : > { %v541_v31 = vmul.f32 0.03125, %v540_v30 }
 0x3b6   : > { %v542_v32 = vadd.f32 1e-05, %v541_v31 }
 0x3b8   : > { %884 = vrsqrt.f32 %v542_v32 }
 0x3c2   : > { %v885_v33 = vpop.eup %884 }
 0x3c3   : > { %v544_v35 = vmul.f32 %v885_v33, %v536_v27 }
 0x3c5   : > { %v551_v37 = vmul.f32 %v731_v34, %v544_v35 }
 0x3c7   : > { %v558_v38 = vadd.f32 %v732_v36, %v551_v37 }
 0x3c9   : > { %559 = vst.msk [vmem:[%s372_s28] sm:$0xff] %vm399_vm1, %v558_v38 }
 0x3ca   : > { %1097 = shalt.err (!%p1094_p0)
}
 0x3cb   : > { %s1098_s13 = scalar_lea.hbm %s1500_s10, 128  ;;  %s1102_s12 = scalar_lea.hbm %s1552_s7, 256 }
 0x3cc   : > { %p1099_p4 = scmp.ne.s32.totalorder %s1500_s10, %s1098_s13  ;;  %p1103_p8 = scmp.lt.u32.totalorder %s1500_s10, %s1552_s7 }
 0x3cd   : > { %p1104_p5 = scmp.lt.u32.totalorder %s1102_s12, %s1098_s13  ;;  %p1106_p6 = scmp.lt.u32.totalorder %s1098_s13, %s1500_s10 }
 0x3ce   : > { %p1100_p10 = pnand %p1099_p4, %p1572_p9 }
 0x3cf   : > { %p1105_p7 = por %p1104_p5, %p1103_p8 }
 0x3d0   : > { %p1101_p11 = pneg %p1100_p10 }
 0x3d1   : > { %p1107_p12 = por %p1106_p6, %p1105_p7 }
 0x3d3   : > { %p1108_p13 = pnand %p1107_p12, %p1101_p11 }
 0x3d5   : > { %1111 = shalt.err (!%p1108_p13)
}
 0x3d6   : > { %791 = dma.vmem_to_hbm [thread:$0]  (%p1572_p9), %s1502_s18, 128, %s1500_s10, %s561_s29  }
 0x3d7 PF: > { %s586_s22 = sand.u32 1, %s1150_s24   ;;  %p1573_p1 = scmp.ne.s32.totalorder %s1563_s14, 0 }
 0x3d8   : > { %p1574_p3 = scmp.ge.s32.totalorder %s1162_s27, 2  ;;  %s587_s19 = scalar_lea.sflag [#allocation4], %s586_s22 }
 0x3da   : > { %p817_p2 = pnand %p1574_p3, %p1573_p1 }
 0x3dc   : > { %1145 = dma.done.wait (!%p817_p2), %s587_s19, 128  }
 0x3dd   : > { %1147 = vsyncadd (!%p817_p2), %s587_s19, 4294967168  ;;  %p23_p0 = scmp.ge.s32.totalorder %s1393_s11, 4   ;;  %s1575_s24 = smov %s1154_s25 }
 0x3de   : > { %s1576_s25 = smov %s1158_s26  ;;  %s1577_s26 = smov %s1404_s23 }
 0x3df   : > { %s1578_s27 = smov %s1393_s11  ;;  %25 = sbr.rel (!%p23_p0) target bundleno = 8 (0x8), region = 117 }
 0x3e6   :  { %592 = vsyncpa [#allocation3], 1 }
 0x3e7   :  { %594 = vsyncpa [#allocation3 + $0x1], 1 }
 0x3e8   :  { %595 = vsyncpa [#allocation6], 1 }
 0x3e9   :  { %596 = vsyncpa [#allocation9], 1 }
 0x3ea   :  { %597 = vsyncpa [#allocation12], 1 }
 0x3eb   :  { %598 = vsyncpa [#allocation4], 1 }
 0x3ec   :  { %600 = vsyncpa [#allocation4 + $0x1], 1 }

// kernel: decoder_layer_forward.3
= control target key start
LH: loop header
LB: loop body
LE: loop exit
PB: predicated region body
PF: predicated region fallthrough
CT: control target
= control target key end

     0   :  { %s4208_s0 = inlined_call_operand.hbm [shape: f32[2,8,32], index: 0, kind: input, shape index: {}, may-alias: {0,1}]   ;;  %s4209_s1 = inlined_call_operand.hbm [shape: f32[2,8,32], index: 1, kind: input, shape index: {}, may-alias: {0,1}]   ;;  %s4210_s2 = inlined_call_operand.hbm [shape: bf16[4,32,8], index: 2, kind: input, shape index: {}]   ;;  %s4211_s3 = inlined_call_operand.hbm [shape: f32[4,1,8], index: 3, kind: input, shape index: {}]   ;;  %s4212_s4 = inlined_call_operand.hbm [shape: bf16[4,32,8], index: 4, kind: input, shape index: {}]   ;;  %s4213_s5 = inlined_call_operand.hbm [shape: f32[4,1,8], index: 5, kind: input, shape index: {}]   ;;  %s4214_s6 = inlined_call_operand.hbm [shape: bf16[4,32,8], index: 6, kind: input, shape index: {}]   ;;  %s4215_s7 = inlined_call_operand.hbm [shape: f32[4,1,8], index: 7, kind: input, shape index: {}]   ;;  %s4216_s8 = inlined_call_operand.hbm [shape: bf16[32,32], index: 8, kind: input, shape index: {}]   ;;  %s4217_s9 = inlined_call_operand.hbm [shape: f32[1,32], index: 9, kind: input, shape index: {}]   ;;  %s4218_s10 = inlined_call_operand.hbm [shape: f32[1,32], index: 10, kind: input, shape index: {}]   ;;  %s4219_s11 = inlined_call_operand.hbm [shape: f32[1,32], index: 11, kind: input, shape index: {}]   ;;  %s4220_s12 = inlined_call_operand.hbm [shape: f32[2,8,32], index: 12, kind: output, shape index: {0}]   ;;  %s4221_s13 = inlined_call_operand.hbm [shape: f32[2,4,8,8], index: 13, kind: output, shape index: {1}]  }
   0x1   :  { %4235 = sst [smem:[#allocation36_spill]] %s4208_s0 }
   0x2   :  { %4236 = sst [smem:[#allocation37_spill]] %s4209_s1 }
   0x3   :  { %4237 = sst [smem:[#allocation38_spill]] %s4210_s2 }
   0x4   :  { %4238 = sst [smem:[#allocation39_spill]] %s4211_s3 }
   0x5   :  { %4239 = sst [smem:[#allocation40_spill]] %s4212_s4 }
   0x6   :  { %4240 = sst [smem:[#allocation41_spill]] %s4213_s5 }
   0x7   :  { %4241 = sst [smem:[#allocation42_spill]] %s4214_s6 }
   0x8   :  { %4242 = sst [smem:[#allocation43_spill]] %s4215_s7 }
   0x9   :  { %4243 = sst [smem:[#allocation44_spill]] %s4216_s8 }
   0xa   :  { %4244 = sst [smem:[#allocation45_spill]] %s4220_s12 }
   0xb   :  { %4245 = sst [smem:[#allocation46_spill]] %s4221_s13 }
   0xc   :  { %19 = vsyncpa [#allocation3], 0 }
   0xd   :  { %21 = vsyncpa [#allocation3 + $0x1], 0 }
   0xe   :  { %22 = vsyncpa [#allocation6], 0 }
   0xf   :  { %24 = vsyncpa [#allocation6 + $0x1], 0 }
  0x10   :  { %25 = vsyncpa [#allocation9], 0 }
  0x11   :  { %26 = vsyncpa [#allocation12], 0 }
  0x12   :  { %27 = vsyncpa [#allocation15], 0 }
  0x13   :  { %28 = vsyncpa [#allocation18], 0 }
  0x14   :  { %29 = vsyncpa [#allocation21], 0 }
  0x15   :  { %30 = vsyncpa [#allocation4], 0 }
  0x16   :  { %32 = vsyncpa [#allocation4 + $0x1], 0 }
  0x17   :  { %33 = vsyncpa [#allocation24], 0 }
  0x18   :  { %35 = vsyncpa [#allocation24 + $0x1], 0  ;;  %s3544_s25 = smov 0   ;;  %s3546_s26 = smov 0  }
  0x19   :  { %s3548_s27 = smov 0   ;;  %s3550_s28 = smov 0  }
  0x1a LB: > { %s3450_s29 = smov [#allocation7]   ;;  %s3565_s14 = sadd.s32 4294967295, %s3448_s28   ;;  %s3448_s28 = sphi %s3550_s28, %s4290_s28   ;;  %s3444_s27 = sphi %s3548_s27, %s4289_s27   ;;  %s3440_s26 = sphi %s3546_s26, %s4288_s26   ;;  %s3436_s25 = sphi %s3544_s25, %s4287_s25  }
  0x1b   : > { %s372_s30 = sshll.u32 %s3450_s29, 4  ;;  %p2415_p0 = scmp.ge.s32.totalorder %s3448_s28, 1  ;;  %s3570_s30 = int_to_ptr.vmem [resolvable:$true] %s372_s30 }
  0x1c   : > { %p4229_p1 = scmp.eq.s32.totalorder %s3565_s14, 0  ;;  %p360_p2 = scmp.lt.s32.totalorder %s3448_s28, 3 }
  0x1d   : > { %s3451_s16 = smov [#allocation8]   ;;  %s3452_s19 = smov [#allocation11]  }
  0x1e   : > { %p3572_p3 = pnand %p2415_p0, %p360_p2  ;;  %s385_s17 = sshll.u32 %s3451_s16, 4  ;;  %s3585_s17 = int_to_ptr.vmem [resolvable:$true] %s385_s17 }
  0x1f   : > { %s3587_s20 = sshll.u32 %s3452_s19, 4  ;;  %s4249_s2 = sld [smem:[#allocation38_spill]]  ;;  %s412_s20 = int_to_ptr.vmem [resolvable:$true] %s3587_s20 }
  0x20   : > { %s4246_s15 = scalar_select %p3572_p3, 1, 0 }
  0x21   : > { %p2819_p5 = pneg %p3572_p3 }
  0x22   : > { %4247 = sst [smem:[#allocation35_spill]] %s4246_s15 }
  0x23   : > { %p3581_p6 = pnand %p2819_p5, %p4229_p1 }
  0x25   : > { %s2982_s23 = scalar_lea.hbm %s4249_s2, 1024  ;;  %p3597_p8 = pneg %p3581_p6 }
  0x26   : > { %p2983_p7 = scmp.ne.s32.totalorder %s4249_s2, %s2982_s23  ;;  %p2989_p11 = scmp.lt.u32.totalorder %s2982_s23, %s4249_s2 }
  0x28   : > { %p2985_p9 = pnand %p3597_p8, %p2983_p7 }
  0x2a   : > { %p2986_p10 = pneg %p2985_p9 }
  0x2c   : > { %p2991_p12 = pnand %p2989_p11, %p2986_p10 }
  0x2e   : > { %2994 = shalt.err (!%p2991_p12)
}
  0x2f   : > { %s2995_s21 = scalar_lea.vmem %s3570_s30, 1024  ;;  %p3003_p5 = scmp.lt.s32.totalorder %s3570_s30, %s3570_s30 }
  0x30   : > { %p2996_p13 = scmp.ne.s32.totalorder %s3570_s30, %s2995_s21  ;;  %p3004_p4 = scmp.lt.s32.totalorder %s2995_s21, %s2995_s21 }
  0x32   : > { %p2998_p0 = pnand %p2996_p13, %p3597_p8  ;;  %p3005_p7 = por %p3004_p4, %p3003_p5 }
  0x34   : > { %p2999_p2 = pneg %p2998_p0 }
  0x36   : > { %p3006_p9 = pnand %p3005_p7, %p2999_p2 }
  0x38   : > { %3009 = shalt.err (!%p3006_p9)
}
  0x39   : > { %s4227_s22 = smov 64   ;;  %s4231_s12 = smov 4  }
  0x3a   : > { %2822 = dma.hbm_to_vmem [thread:$0]  (!%p3581_p6), %s4249_s2, 1024, %s3570_s30, [#allocation6], %s4227_s22, %s4227_s22, %s4231_s12  }
  0x3b   : > { %s4251_s3 = sld [smem:[#allocation39_spill]] }
  0x41   : > { %s3010_s21 = scalar_lea.hbm %s4251_s3, 64 }
  0x42   : > { %p3011_p4 = scmp.ne.s32.totalorder %s4251_s3, %s3010_s21  ;;  %p3017_p12 = scmp.lt.u32.totalorder %s3010_s21, %s4251_s3 }
  0x44   : > { %p3013_p10 = pnand %p3011_p4, %p3597_p8 }
  0x46   : > { %p3014_p11 = pneg %p3013_p10 }
  0x48   : > { %p3019_p13 = pnand %p3017_p12, %p3014_p11 }
  0x4a   : > { %3022 = shalt.err (!%p3019_p13)
}
  0x4b   : > { %s3023_s30 = scalar_lea.vmem %s3585_s17, 64  ;;  %p3031_p7 = scmp.lt.s32.totalorder %s3585_s17, %s3585_s17 }
  0x4c   : > { %p3024_p0 = scmp.ne.s32.totalorder %s3585_s17, %s3023_s30  ;;  %p3032_p9 = scmp.lt.s32.totalorder %s3023_s30, %s3023_s30 }
  0x4e   : > { %p3026_p2 = pnand %p3024_p0, %p3597_p8  ;;  %p3033_p4 = por %p3032_p9, %p3031_p7 }
  0x50   : > { %p3027_p5 = pneg %p3026_p2 }
  0x52   : > { %p3034_p10 = pnand %p3033_p4, %p3027_p5 }
  0x54   : > { %3037 = shalt.err (!%p3034_p10)
}
  0x55   : > { %s3455_s13 = smov 16   ;;  %s3456_s0 = smov 1  }
  0x56   : > { %2825 = dma.hbm_to_vmem [thread:$0]  (!%p3581_p6), %s4251_s3, 64, %s3585_s17, [#allocation9], %s3455_s13, %s3455_s13, %s3456_s0  }
  0x57   : > { %s4252_s5 = sld [smem:[#allocation41_spill]] }
  0x5d   : > { %s3038_s29 = scalar_lea.hbm %s4252_s5, 64 }
  0x5e   : > { %p3039_p11 = scmp.ne.s32.totalorder %s4252_s5, %s3038_s29  ;;  %p3045_p0 = scmp.lt.u32.totalorder %s3038_s29, %s4252_s5 }
  0x60   : > { %p3041_p12 = pnand %p3039_p11, %p3597_p8 }
  0x62   : > { %p3042_p13 = pneg %p3041_p12 }
  0x64   : > { %p3047_p2 = pnand %p3045_p0, %p3042_p13 }
  0x66   : > { %3050 = shalt.err (!%p3047_p2)
}
  0x67   : > { %s3051_s1 = scalar_lea.vmem %s412_s20, 64  ;;  %p3059_p4 = scmp.lt.s32.totalorder %s412_s20, %s412_s20 }
  0x68   : > { %p3052_p5 = scmp.ne.s32.totalorder %s412_s20, %s3051_s1  ;;  %p3060_p10 = scmp.lt.s32.totalorder %s3051_s1, %s3051_s1 }
  0x6a   : > { %p3054_p7 = pnand %p3052_p5, %p3597_p8  ;;  %p3061_p1 = por %p3060_p10, %p3059_p4 }
  0x6c   : > { %p3055_p9 = pneg %p3054_p7 }
  0x6e   : > { %p3062_p3 = pnand %p3061_p1, %p3055_p9 }
  0x70   : > { %3065 = shalt.err (!%p3062_p3)
}
  0x71   : > { %2831 = dma.hbm_to_vmem [thread:$0]  (!%p3581_p6), %s4252_s5, 64, %s412_s20, [#allocation12], %s3455_s13, %s3455_s13, %s3456_s0  }
  0x72   : > { %s3457_s15 = smov [#allocation14]   ;;  %s3458_s24 = smov [#allocation17]  }
  0x73   : > { %s437_s23 = sshll.u32 %s3457_s15, 4  ;;  %s464_s29 = sshll.u32 %s3458_s24, 4  ;;  %s438_s23 = int_to_ptr.vmem [resolvable:$true] %s437_s23  ;;  %s465_s29 = int_to_ptr.vmem [resolvable:$true] %s464_s29 }
  0x74   : > { %s4253_s7 = sld [smem:[#allocation43_spill]] }
  0x7a   : > { %s3066_s30 = scalar_lea.hbm %s4253_s7, 64 }
  0x7b   : > { %p3067_p1 = scmp.ne.s32.totalorder %s4253_s7, %s3066_s30  ;;  %p3073_p12 = scmp.lt.u32.totalorder %s3066_s30, %s4253_s7 }
  0x7d   : > { %p3069_p3 = pnand %p3067_p1, %p3597_p8 }
  0x7f   : > { %p3070_p11 = pneg %p3069_p3 }
  0x81   : > { %p3075_p13 = pnand %p3073_p12, %p3070_p11 }
  0x83   : > { %3078 = shalt.err (!%p3075_p13)
}
  0x84   : > { %s3079_s20 = scalar_lea.vmem %s438_s23, 64  ;;  %p3087_p7 = scmp.lt.s32.totalorder %s438_s23, %s438_s23 }
  0x85   : > { %p3080_p0 = scmp.ne.s32.totalorder %s438_s23, %s3079_s20  ;;  %p3088_p9 = scmp.lt.s32.totalorder %s3079_s20, %s3079_s20 }
  0x87   : > { %p3082_p2 = pnand %p3080_p0, %p3597_p8  ;;  %p3089_p4 = por %p3088_p9, %p3087_p7 }
  0x89   : > { %p3083_p5 = pneg %p3082_p2 }
  0x8b   : > { %p3090_p10 = pnand %p3089_p4, %p3083_p5 }
  0x8d   : > { %3093 = shalt.err (!%p3090_p10)
}
  0x8e   : > { %2837 = dma.hbm_to_vmem [thread:$0]  (!%p3581_p6), %s4253_s7, 64, %s438_s23, [#allocation15], %s3455_s13, %s3455_s13, %s3456_s0  }
  0x8f   : > { %s3094_s24 = scalar_lea.hbm %s4217_s9, 16 }
  0x90   : > { %p3095_p1 = scmp.ne.s32.totalorder %s4217_s9, %s3094_s24  ;;  %p3101_p12 = scmp.lt.u32.totalorder %s3094_s24, %s4217_s9 }
  0x92   : > { %p3097_p3 = pnand %p3095_p1, %p3597_p8 }
  0x94   : > { %p3098_p11 = pneg %p3097_p3 }
  0x96   : > { %p3103_p13 = pnand %p3101_p12, %p3098_p11 }
  0x98   : > { %3106 = shalt.err (!%p3103_p13)
}
  0x99   : > { %s3107_s17 = scalar_lea.vmem %s465_s29, 16  ;;  %s3114_s13 = scalar_lea.vmem %s465_s29, 32 }
  0x9a   : > { %p3108_p0 = scmp.ne.s32.totalorder %s465_s29, %s3107_s17  ;;  %p3115_p7 = scmp.lt.s32.totalorder %s465_s29, %s465_s29 }
  0x9b   : > { %p3116_p9 = scmp.lt.s32.totalorder %s3114_s13, %s3107_s17 }
  0x9c   : > { %p3110_p2 = pnand %p3108_p0, %p3597_p8 }
  0x9d   : > { %p3117_p4 = por %p3116_p9, %p3115_p7 }
  0x9e   : > { %p3111_p5 = pneg %p3110_p2 }
  0xa0   : > { %p3118_p10 = pnand %p3117_p4, %p3111_p5 }
  0xa2   : > { %3121 = shalt.err (!%p3118_p10)
}
  0xa3   : > { %2843 = dma.hbm_to_vmem [thread:$0]  (!%p3581_p6), %s4217_s9, 16, %s465_s29, [#allocation18]  }
  0xa4   : > { %s3459_s20 = smov [#allocation10]   ;;  %s3460_s12 = smov [#allocation13]  }
  0xa5   : > { %s398_s2 = sshll.u32 %s3459_s20, 4  ;;  %s424_s22 = sshll.u32 %s3460_s12, 4  ;;  %s399_s2 = int_to_ptr.vmem [resolvable:$true] %s398_s2  ;;  %s425_s22 = int_to_ptr.vmem [resolvable:$true] %s424_s22 }
  0xa6   : > { %s4254_s4 = sld [smem:[#allocation40_spill]] }
  0xac   : > { %s3122_s19 = scalar_lea.hbm %s4254_s4, 1024 }
  0xad   : > { %p3123_p1 = scmp.ne.s32.totalorder %s4254_s4, %s3122_s19  ;;  %p3129_p12 = scmp.lt.u32.totalorder %s3122_s19, %s4254_s4 }
  0xaf   : > { %p3125_p3 = pnand %p3123_p1, %p3597_p8 }
  0xb1   : > { %p3126_p11 = pneg %p3125_p3 }
  0xb3   : > { %p3131_p13 = pnand %p3129_p12, %p3126_p11 }
  0xb5   : > { %3134 = shalt.err (!%p3131_p13)
}
  0xb6   : > { %s3135_s29 = scalar_lea.vmem %s399_s2, 1024  ;;  %p3143_p7 = scmp.lt.s32.totalorder %s399_s2, %s399_s2 }
  0xb7   : > { %p3136_p0 = scmp.ne.s32.totalorder %s399_s2, %s3135_s29  ;;  %p3144_p9 = scmp.lt.s32.totalorder %s3135_s29, %s3135_s29 }
  0xb9   : > { %p3138_p2 = pnand %p3136_p0, %p3597_p8  ;;  %p3145_p4 = por %p3144_p9, %p3143_p7 }
  0xbb   : > { %p3139_p5 = pneg %p3138_p2 }
  0xbd   : > { %p3146_p10 = pnand %p3145_p4, %p3139_p5 }
  0xbf   : > { %3149 = shalt.err (!%p3146_p10)
}
  0xc0   : > { %s4255_s13 = smov 4   ;;  %s4256_s0 = smov 64  }
  0xc1   : > { %2828 = dma.hbm_to_vmem [thread:$0]  (!%p3581_p6), %s4254_s4, 1024, %s399_s2, [#allocation9], %s4256_s0, %s4256_s0, %s4255_s13  }
  0xc2   : > { %s4257_s6 = sld [smem:[#allocation42_spill]] }
  0xc8   : > { %s3150_s24 = scalar_lea.hbm %s4257_s6, 1024 }
  0xc9   : > { %p3151_p1 = scmp.ne.s32.totalorder %s4257_s6, %s3150_s24  ;;  %p3157_p12 = scmp.lt.u32.totalorder %s3150_s24, %s4257_s6 }
  0xcb   : > { %p3153_p3 = pnand %p3151_p1, %p3597_p8 }
  0xcd   : > { %p3154_p11 = pneg %p3153_p3 }
  0xcf   : > { %p3159_p13 = pnand %p3157_p12, %p3154_p11 }
  0xd1   : > { %3162 = shalt.err (!%p3159_p13)
}
  0xd2   : > { %s3163_s17 = scalar_lea.vmem %s425_s22, 1024  ;;  %p3171_p7 = scmp.lt.s32.totalorder %s425_s22, %s425_s22 }
  0xd3   : > { %p3164_p0 = scmp.ne.s32.totalorder %s425_s22, %s3163_s17  ;;  %p3172_p9 = scmp.lt.s32.totalorder %s3163_s17, %s3163_s17 }
  0xd5   : > { %p3166_p2 = pnand %p3164_p0, %p3597_p8  ;;  %p3173_p4 = por %p3172_p9, %p3171_p7 }
  0xd7   : > { %p3167_p5 = pneg %p3166_p2 }
  0xd9   : > { %p3174_p10 = pnand %p3173_p4, %p3167_p5 }
  0xdb   : > { %3177 = shalt.err (!%p3174_p10)
}
  0xdc   : > { %2834 = dma.hbm_to_vmem [thread:$0]  (!%p3581_p6), %s4257_s6, 1024, %s425_s22, [#allocation12], %s4256_s0, %s4256_s0, %s4255_s13  }
  0xdd   : > { %s3461_s23 = smov [#allocation16]   ;;  %s3462_s12 = smov [#allocation19]  }
  0xde   : > { %s450_s20 = sshll.u32 %s3461_s23, 4  ;;  %s475_s15 = sshll.u32 %s3462_s12, 4  ;;  %s451_s20 = int_to_ptr.vmem [resolvable:$true] %s450_s20  ;;  %s476_s15 = int_to_ptr.vmem [resolvable:$true] %s475_s15 }
  0xdf   : > { %s4258_s8 = sld [smem:[#allocation44_spill]] }
  0xe5   : > { %s3178_s21 = scalar_lea.hbm %s4258_s8, 256 }
  0xe6   : > { %p3179_p1 = scmp.ne.s32.totalorder %s4258_s8, %s3178_s21  ;;  %p3185_p12 = scmp.lt.u32.totalorder %s3178_s21, %s4258_s8 }
  0xe8   : > { %p3181_p3 = pnand %p3179_p1, %p3597_p8 }
  0xea   : > { %p3182_p11 = pneg %p3181_p3 }
  0xec   : > { %p3187_p13 = pnand %p3185_p12, %p3182_p11 }
  0xee   : > { %3190 = shalt.err (!%p3187_p13)
}
  0xef   : > { %s3191_s22 = scalar_lea.vmem %s451_s20, 256  ;;  %p3199_p7 = scmp.lt.s32.totalorder %s451_s20, %s451_s20 }
  0xf0   : > { %p3192_p0 = scmp.ne.s32.totalorder %s451_s20, %s3191_s22  ;;  %p3200_p9 = scmp.lt.s32.totalorder %s3191_s22, %s3191_s22 }
  0xf2   : > { %p3194_p2 = pnand %p3192_p0, %p3597_p8  ;;  %p3201_p4 = por %p3200_p9, %p3199_p7 }
  0xf4   : > { %p3195_p5 = pneg %p3194_p2 }
  0xf6   : > { %p3202_p10 = pnand %p3201_p4, %p3195_p5 }
  0xf8   : > { %3205 = shalt.err (!%p3202_p10)
}
  0xf9   : > { %2840 = dma.hbm_to_vmem [thread:$0]  (!%p3581_p6), %s4258_s8, 256, %s451_s20, [#allocation15], %s4256_s0, %s4256_s0, %s4255_s13  }
  0xfa   : > { %s3206_s19 = scalar_lea.hbm %s4218_s10, 16 }
  0xfb   : > { %p3207_p1 = scmp.ne.s32.totalorder %s4218_s10, %s3206_s19  ;;  %p3213_p12 = scmp.lt.u32.totalorder %s3206_s19, %s4218_s10 }
  0xfd   : > { %p3209_p3 = pnand %p3207_p1, %p3597_p8 }
  0xff   : > { %p3210_p11 = pneg %p3209_p3 }
 0x101   : > { %p3215_p13 = pnand %p3213_p12, %p3210_p11 }
 0x103   : > { %3218 = shalt.err (!%p3215_p13)
}
 0x104   : > { %s3219_s2 = scalar_lea.vmem %s476_s15, 16  ;;  %s3226_s13 = scalar_lea.vmem %s476_s15, 32 }
 0x105   : > { %p3220_p0 = scmp.ne.s32.totalorder %s476_s15, %s3219_s2  ;;  %p3227_p7 = scmp.lt.s32.totalorder %s476_s15, %s476_s15 }
 0x106   : > { %p3228_p9 = scmp.lt.s32.totalorder %s3226_s13, %s3219_s2 }
 0x107   : > { %p3222_p2 = pnand %p3220_p0, %p3597_p8 }
 0x108   : > { %p3229_p4 = por %p3228_p9, %p3227_p7 }
 0x109   : > { %p3223_p5 = pneg %p3222_p2 }
 0x10b   : > { %p3230_p10 = pnand %p3229_p4, %p3223_p5 }
 0x10d   : > { %3233 = shalt.err (!%p3230_p10)
}
 0x10e   : > { %2846 = dma.hbm_to_vmem [thread:$0]  (!%p3581_p6), %s4218_s10, 16, %s476_s15, [#allocation18]  }
 0x10f   : > { %s3463_s22 = smov [#allocation20]   ;;  %s3234_s24 = scalar_lea.hbm %s4219_s11, 16 }
 0x110   : > { %s486_s29 = sshll.u32 %s3463_s22, 4  ;;  %p3235_p1 = scmp.ne.s32.totalorder %s4219_s11, %s3234_s24  ;;  %s487_s29 = int_to_ptr.vmem [resolvable:$true] %s486_s29 }
 0x111   : > { %p3241_p12 = scmp.lt.u32.totalorder %s3234_s24, %s4219_s11 }
 0x112   : > { %p3237_p3 = pnand %p3235_p1, %p3597_p8 }
 0x114   : > { %p3238_p11 = pneg %p3237_p3 }
 0x116   : > { %p3243_p13 = pnand %p3241_p12, %p3238_p11 }
 0x118   : > { %3246 = shalt.err (!%p3243_p13)
}
 0x119   : > { %s3247_s15 = scalar_lea.vmem %s487_s29, 16  ;;  %s3254_s17 = scalar_lea.vmem %s487_s29, 32 }
 0x11a   : > { %p3248_p0 = scmp.ne.s32.totalorder %s487_s29, %s3247_s15  ;;  %p3255_p7 = scmp.lt.s32.totalorder %s487_s29, %s487_s29 }
 0x11b   : > { %p3256_p9 = scmp.lt.s32.totalorder %s3254_s17, %s3247_s15 }
 0x11c   : > { %p3250_p2 = pnand %p3248_p0, %p3597_p8 }
 0x11d   : > { %p3257_p4 = por %p3256_p9, %p3255_p7 }
 0x11e   : > { %p3251_p5 = pneg %p3250_p2 }
 0x120   : > { %p3258_p10 = pnand %p3257_p4, %p3251_p5 }
 0x122   : > { %3261 = shalt.err (!%p3258_p10)
}
 0x123   : > { %2849 = dma.hbm_to_vmem [thread:$0]  (!%p3581_p6), %s4219_s11, 16, %s487_s29, [#allocation21]  }
 0x124   : > { %s2414_s16 = sadd.s32 4294967294, %s3448_s28   ;;  %s3809_s18 = sadd.s32 1, %s3448_s28  }
 0x125   : > { %s45_s0 = ssub.s32 %s3448_s28, %s3809_s18  ;;  %s48_s20 = sadd.s32 1, %s3444_s27 }
 0x126   : > { %p46_p8 = scmp.eq.s32.totalorder %s45_s0, 0  ;;  %p55_p1 = scmp.ne.s32.totalorder %s3444_s27, %s3440_s26 }
 0x127   : > { %p56_p3 = scmp.eq.s32.totalorder %s3448_s28, 0  ;;  %p61_p11 = scmp.ne.s32.totalorder %s3440_s26, %s3436_s25 }
 0x128   : > { %s3820_s22 = scalar_select %p46_p8, %s3444_s27, %s48_s20  }
 0x129   : > { %p3822_p12 = por %p56_p3, %p55_p1  ;;  %p4260_p13 = scmp.eq.s32.totalorder %s3565_s14, 0 }
 0x12a   : > { %p321_p0 = scmp.eq.s32.totalorder %s3565_s14, 1  ;;  %p327_p2 = scmp.eq.s32.totalorder %s2414_s16, 1 }
 0x12b   : > { %p3828_p6 = por %p4260_p13, %p61_p11  ;;  %p2874_p5 = scmp.lt.s32.totalorder %s3448_s28, 2 }
 0x12c   : > { %s497_s12 = sand.u32 1, %s3444_s27   ;;  %p3835_p7 = por %p321_p0, %p55_p1 }
 0x12d   : > { %s4261_s29 = scalar_select %p3828_p6, 1, 0 }
 0x12e   : > { %s4262_s24 = scalar_select %p3835_p7, 1, 0 }
 0x12f   : > { %p3839_p9 = por %p327_p2, %p61_p11  ;;  %s3843_s21 = sshll.u32 %s497_s12, 3 }
 0x130   : > { %s2428_s30 = sshll.u32 %s3448_s28, 7  ;;  %s4264_s17 = sld [smem:[#allocation36_spill]] }
 0x131   : > { %s4263_s19 = scalar_select %p3839_p9, 1, 0 }
 0x132   : > { %s501_s13 = scalar_lea.vmem [#allocation2], %s3843_s21  ;;  %p3856_p4 = pnand %p2874_p5, %p3822_p12 }
 0x133   : > { %s508_s16 = sshll.u32 %s501_s13, 4  ;;  %s4266_s4 = sld [smem:[#allocation37_spill]]  ;;  %s3852_s16 = int_to_ptr.vmem [resolvable:$true] %s508_s16 }
 0x134   : > { %s515_s15 = sand.u32 1, %s3448_s28   ;;  %s498_s5 = scalar_lea.sflag [#allocation3], %s497_s12 }
 0x135   : > { %p3264_p8 = pneg %p3856_p4 }
 0x136   : > { %s3849_s2 = scalar_lea.hbm %s4264_s17, %s2428_s30  ;;  %s3267_s7 = scalar_lea.hbm %s4264_s17, 256 }
 0x137   : > { %s3262_s6 = scalar_lea.hbm %s3849_s2, 128  ;;  %p3268_p11 = scmp.lt.u32.totalorder %s3849_s2, %s4264_s17 }
 0x138   : > { %p3263_p10 = scmp.ne.s32.totalorder %s3849_s2, %s3262_s6  ;;  %p3269_p12 = scmp.lt.u32.totalorder %s3267_s7, %s3262_s6 }
 0x139   : > { %s3863_s1 = scalar_lea.hbm %s4266_s4, %s2428_s30  ;;  %p3271_p0 = scmp.lt.u32.totalorder %s3262_s6, %s3849_s2 }
 0x13a   : > { %p3265_p1 = pnand %p3264_p8, %p3263_p10  ;;  %p3270_p13 = por %p3269_p12, %p3268_p11 }
 0x13c   : > { %p3266_p3 = pneg %p3265_p1  ;;  %p3272_p2 = por %p3271_p0, %p3270_p13 }
 0x13e   : > { %p3273_p5 = pnand %p3272_p2, %p3266_p3 }
 0x140   : > { %3276 = shalt.err (!%p3273_p5)
}
 0x141   : > { %s3277_s12 = scalar_lea.vmem %s3852_s16, 128  ;;  %s3464_s30 = smov [#allocation2]  }
 0x142   : > { %p3278_p10 = scmp.ne.s32.totalorder %s3852_s16, %s3277_s12  ;;  %s3282_s20 = sshll.u32 %s3464_s30, 4  ;;  %s3283_s20 = int_to_ptr.vmem [resolvable:$false] %s3282_s20 }
 0x143   : > { %s3284_s8 = scalar_lea.vmem %s3283_s20, 256  ;;  %p3285_p7 = scmp.lt.s32.totalorder %s3852_s16, %s3283_s20 }
 0x144   : > { %p3280_p1 = pnand %p3278_p10, %p3264_p8  ;;  %p3286_p11 = scmp.lt.s32.totalorder %s3284_s8, %s3277_s12 }
 0x146   : > { %p3281_p9 = pneg %p3280_p1  ;;  %p3287_p12 = por %p3286_p11, %p3285_p7 }
 0x148   : > { %p3288_p13 = pnand %p3287_p12, %p3281_p9 }
 0x14a   : > { %3291 = shalt.err (!%p3288_p13)
}
 0x14b   : > { %2853 = dma.hbm_to_vmem [thread:$0]  (!%p3856_p4), %s3849_s2, 128, %s3852_s16, %s498_s5  }
 0x14c   : > { %s519_s6 = scalar_lea.vmem [#allocation5], %s3843_s21  ;;  %s516_s23 = scalar_lea.sflag [#allocation6], %s515_s15 }
 0x14d   : > { %s526_s7 = sshll.u32 %s519_s6, 4  ;;  %s3292_s13 = scalar_lea.hbm %s3863_s1, 128  ;;  %s527_s7 = int_to_ptr.vmem [resolvable:$true] %s526_s7 }
 0x14e   : > { %p3293_p7 = scmp.ne.s32.totalorder %s3863_s1, %s3292_s13  ;;  %s3297_s30 = scalar_lea.hbm %s4266_s4, 256 }
 0x14f   : > { %p3298_p0 = scmp.lt.u32.totalorder %s3863_s1, %s4266_s4  ;;  %p3299_p2 = scmp.lt.u32.totalorder %s3297_s30, %s3292_s13 }
 0x150   : > { %p3295_p9 = pnand %p3293_p7, %p3264_p8  ;;  %p3301_p10 = scmp.lt.u32.totalorder %s3292_s13, %s3863_s1 }
 0x151   : > { %p3300_p5 = por %p3299_p2, %p3298_p0 }
 0x152   : > { %p3296_p3 = pneg %p3295_p9 }
 0x153   : > { %p3302_p1 = por %p3301_p10, %p3300_p5 }
 0x155   : > { %p3303_p11 = pnand %p3302_p1, %p3296_p3 }
 0x157   : > { %3306 = shalt.err (!%p3303_p11)
}
 0x158   : > { %s3307_s5 = scalar_lea.vmem %s527_s7, 128  ;;  %s3465_s21 = smov [#allocation5]  }
 0x159   : > { %p3308_p12 = scmp.ne.s32.totalorder %s527_s7, %s3307_s5  ;;  %s3312_s2 = sshll.u32 %s3465_s21, 4  ;;  %s3313_s2 = int_to_ptr.vmem [resolvable:$false] %s3312_s2 }
 0x15a   : > { %s3314_s16 = scalar_lea.vmem %s3313_s2, 256  ;;  %p3315_p9 = scmp.lt.s32.totalorder %s527_s7, %s3313_s2 }
 0x15b   : > { %p3310_p13 = pnand %p3308_p12, %p3264_p8  ;;  %p3316_p6 = scmp.lt.s32.totalorder %s3314_s16, %s3307_s5 }
 0x15d   : > { %p3311_p7 = pneg %p3310_p13  ;;  %p3317_p0 = por %p3316_p6, %p3315_p9 }
 0x15f   : > { %p3318_p2 = pnand %p3317_p0, %p3311_p7 }
 0x161   : > { %3321 = shalt.err (!%p3318_p2)
}
 0x162   : > { %2856 = dma.hbm_to_vmem [thread:$0]  (!%p3856_p4), %s3863_s1, 128, %s527_s7, %s516_s23  }
 0x163   : > { %s4267_s15 = sld [smem:[#allocation35_spill]] }
 0x169   : > { %p4268_p3 = scmp.ne.s32.totalorder %s4267_s15, 0 }
 0x16a   : > { %s3916_s6 = sand.u32 (!%p4268_p3), 1, %s3440_s26   ;;  %p4269_p6 = scmp.ne.s32.totalorder (!%p4268_p3), %s4261_s29, 0 }
 0x16b   : > { %535 = sbr.rel (%p4268_p3) target bundleno = 2286 (0x8ee), region = 68  ;;  %s3919_s13 = sshll.u32 (!%p4268_p3), %s3916_s6, 3 }
 0x16c   : > { %s538_s3 = scalar_lea.sflag (!%p4268_p3), [#allocation3], %s3916_s6  ;;  %s541_s12 = scalar_lea.vmem (!%p4268_p3), [#allocation2], %s3919_s13 }
 0x172   : > { %3395 = dma.done.wait (%p4269_p6), %s538_s3, 128  }
 0x173   : > { %3397 = vsyncadd (%p4269_p6), %s538_s3, 4294967168  ;;  %s546_s0 = sand.u32 1, %s3565_s14   ;;  %s550_s7 = scalar_lea.vmem [#allocation5], %s3919_s13 }
 0x174   : > { %s547_s1 = scalar_lea.sflag [#allocation6], %s546_s0 }
 0x175   : > { %3399 = dma.done.wait (%p4269_p6), %s547_s1, 128  }
 0x176   : > { %3401 = vsyncadd (%p4269_p6), %s547_s1, 4294967168  ;;  %p4270_p4 = scmp.eq.s32.totalorder %s3565_s14, 0 }
 0x178   : > { %3403 = dma.done.wait (%p4270_p4), [#allocation6], 1024   ;;  %p4271_p8 = pmov %p4270_p4 }
 0x179   : > { %p4272_p5 = pmov %p4270_p4 }
 0x17a   : > { %3405 = vsyncadd (%p4271_p8), [#allocation6], 4294966272 }
 0x17b   : > { %3407 = dma.done.wait (%p4272_p5), [#allocation9], 1088   ;;  %p4273_p10 = pmov %p4270_p4 }
 0x17c   : > { %p4274_p1 = pmov %p4270_p4 }
 0x17d   : > { %3409 = vsyncadd (%p4273_p10), [#allocation9], 4294966208 }
 0x17e   : > { %3411 = dma.done.wait (%p4274_p1), [#allocation12], 1088   ;;  %p4275_p11 = pmov %p4274_p1 }
 0x17f   : > { %p4276_p12 = pmov %p4274_p1 }
 0x180   : > { %3413 = vsyncadd (%p4275_p11), [#allocation12], 4294966208 }
 0x181   : > { %3415 = dma.done.wait (%p4276_p12), [#allocation15], 320   ;;  %p4277_p13 = pmov %p4274_p1 }
 0x182   : > { %p4278_p7 = pmov %p4274_p1 }
 0x183   : > { %3417 = vsyncadd (%p4277_p13), [#allocation15], 4294966976 }
 0x184   : > { %3419 = dma.done.wait (%p4278_p7), [#allocation18], 32   ;;  %p4279_p9 = pmov %p4274_p1 }
 0x185   : > { %p4280_p0 = pmov %p4274_p1 }
 0x186   : > { %3421 = vsyncadd (%p4279_p9), [#allocation18], 4294967264 }
 0x187   : > { %3423 = dma.done.wait (%p4280_p0), [#allocation21], 16   ;;  %p4281_p2 = pmov %p4280_p0 }
 0x188   : > { %v3466_v0 = vmov 0.0   ;;  %vm3467_vm0 = vmmov 0   ;;  %v2938_v1 = vld [vmem:[#allocation7] sm:$0xff]   ;;  %v2939_v2 = vld [vmem:[#allocation7 + $0x10] sm:$0xff]   ;;  %v2940_v3 = vld [vmem:[#allocation7 + $0x8] sm:$0xff]   ;;  %vm704_vm1 = vcmask 261120  }
 0x189   : > { %3425 = vsyncadd (%p4281_p2), [#allocation21], 4294967280  ;;  %2587 = vmatprep.subr.bf16.mxu0 %v3466_v0  ;;  %2595 = vmatprep.subr.bf16.mxu1 %v3466_v0  ;;  %v2941_v4 = vld [vmem:[#allocation7 + $0x18] sm:$0xff]   ;;  %v3967_v5 = vld [vmem:[%s541_s12] sm:$0xff]  ;;  %vm1419_vm2 = vcmask 64512   ;;  %vm1667_vm3 = vcmask 1043456  }
 0x18a   : > { %2591 = vmatprep.mubr.msk.bf16.mxu0 %vm3467_vm0, %v3466_v0  ;;  %2599 = vmatprep.mubr.msk.bf16.mxu1 %vm3467_vm0, %v3466_v0  ;;  %v645_v6 = vpack.c.bf16 %v3967_v5, %v3967_v5  ;;  %v2942_v7 = vld [vmem:[#allocation7 + $0x20] sm:$0xff]   ;;  %v2943_v8 = vld [vmem:[#allocation7 + $0x30] sm:$0xff]   ;;  %v2944_v9 = vld [vmem:[#allocation7 + $0x28] sm:$0xff]   ;;  %s2445_s29 = sshll.u32 %s3916_s6, 5  ;;  %s3468_s30 = smov 8   ;;  %vm2056_vm8 = vcmask 130048  }
 0x18b   : > { %2588 = vmatpush3.bf16.msra.mxu0 %v2938_v1  ;;  %2596 = vmatpush3.bf16.msra.mxu1 %v2939_v2  ;;  %v2945_v10 = vld [vmem:[#allocation7 + $0x38] sm:$0xff]   ;;  %v2946_v11 = vld [vmem:[#allocation10] sm:$0xff]   ;;  %v2948_v13 = vld [vmem:[#allocation10 + $0x8] sm:$0xff]   ;;  %s4070_s23 = scalar_lea.vmem [#allocation23], %s2445_s29  ;;  %s3469_s20 = smov 16   ;;  %vm2058_vm9 = vcmask 195584  }
 0x18c   : > { %2589 = vmatprep.subr.bf16.mxu0 %v3466_v0  ;;  %2597 = vmatprep.subr.bf16.mxu1 %v3466_v0  ;;  %v2947_v12 = vld [vmem:[#allocation10 + $0x10] sm:$0xff]   ;;  %v2949_v14 = vld [vmem:[#allocation10 + $0x18] sm:$0xff]   ;;  %v2950_v16 = vld [vmem:[#allocation10 + $0x20] sm:$0xff]   ;;  %s3470_s8 = smov 24   ;;  %s2519_s5 = sshll.u32 %s3565_s14, 9 }
 0x18d   : > { %v646_v15 = vld [vmem:[%s550_s7] sm:$0xff]  ;;  %v2954_v21 = vld [vmem:[#allocation13] sm:$0xff]   ;;  %v2957_v24 = vld [vmem:[#allocation13 + $0x18] sm:$0xff]   ;;  %s2191_s21 = sshll.u32 %s4070_s23, 4  ;;  %s4282_s15 = sld [smem:[#allocation46_spill]]  ;;  %s4131_s21 = int_to_ptr.vmem [resolvable:$true] %s2191_s21 }
 0x18e   : > { %v647_v17 = vpack.c.bf16 %v646_v15, %v646_v15  ;;  %v2951_v18 = vld [vmem:[#allocation10 + $0x30] sm:$0xff]   ;;  %v2952_v19 = vld [vmem:[#allocation10 + $0x28] sm:$0xff]   ;;  %v2953_v20 = vld [vmem:[#allocation10 + $0x38] sm:$0xff]   ;;  %s2165_s12 = scalar_lea.sflag [#allocation24], %s3916_s6  ;;  %s3322_s0 = scalar_lea.vmem %s4131_s21, 512 }
 0x18f   : > { %2590 = vmatpush3.bf16.msra.mxu0 %v2940_v3  ;;  %2598 = vmatpush3.bf16.msra.mxu1 %v2941_v4  ;;  %v2955_v22 = vld [vmem:[#allocation13 + $0x10] sm:$0xff]   ;;  %v2956_v23 = vld [vmem:[#allocation13 + $0x8] sm:$0xff]   ;;  %v2958_v25 = vld [vmem:[#allocation13 + $0x20] sm:$0xff]   ;;  %p3323_p3 = scmp.ne.s32.totalorder %s4131_s21, %s3322_s0  ;;  %p4283_p6 = scmp.ne.s32.totalorder %s4262_s24, 0 }
 0x190   : > { %2603 = vmatprep.subr.bf16.mxu0 %v3466_v0  ;;  %2611 = vmatprep.subr.bf16.mxu1 %v3466_v0  ;;  %v2959_v26 = vld [vmem:[#allocation13 + $0x30] sm:$0xff]   ;;  %v2960_v27 = vld [vmem:[#allocation13 + $0x28] sm:$0xff]   ;;  %v2961_v28 = vld [vmem:[#allocation13 + $0x38] sm:$0xff]   ;;  %s3471_s1 = smov [#allocation23]  }
 0x191   : > { %v2462_v45 = vld [vmem:[#allocation11] ss:$0 sm:$0xff]  ;;  %v2463_v46 = vld [vmem:[#allocation11 + $0x1] ss:$0 sm:$0xff]  ;;  %v2446_v57 = vld [vmem:[#allocation8] ss:$0 sm:$0xff]  ;;  %p3324_p4 = pnand %p3323_p3, %p4283_p6 }
 0x192   : > { %2592 = vmatmul.mubr.msk.bf16.vlgmr.msra.gmra.mrb[0].mxu0 %vm704_vm1, %v645_v6  ;;  %2600 = vmatmul.mubr.msk.bf16.vlgmr.msra.gmra.mrb[0].mxu1 %vm704_vm1, %v645_v6  ;;  %v2447_v60 = vld [vmem:[#allocation8 + $0x1] ss:$0 sm:$0xff]  ;;  %v2464_v63 = vld [vmem:[#allocation11 + $0x2] ss:$0 sm:$0xff]  ;;  %v2465_v2 = vld [vmem:[#allocation11 + $0x3] ss:$0 sm:$0xff] }
 0x193   : > { %2604 = vmatpush3.bf16.msra.mxu0 %v2942_v7  ;;  %2612 = vmatpush3.bf16.msra.mxu1 %v2943_v8  ;;  %s4129_s3 = scalar_lea.hbm %s4282_s15, %s2519_s5  ;;  %p3325_p8 = pneg %p3324_p4 }
 0x194   : > { %2605 = vmatprep.subr.bf16.mxu0 %v3466_v0  ;;  %2613 = vmatprep.subr.bf16.mxu1 %v3466_v0  ;;  %s3326_s7 = sshll.u32 %s3471_s1, 4  ;;  %s3327_s7 = int_to_ptr.vmem [resolvable:$false] %s3326_s7 }
 0x195   : > { %2607 = vmatprep.mubr.msk.bf16.mxu0 %vm3467_vm0, %v3466_v0  ;;  %2615 = vmatprep.mubr.msk.bf16.mxu1 %vm3467_vm0, %v3466_v0  ;;  %s3328_s29 = scalar_lea.vmem %s3327_s7, 1024  ;;  %p3329_p5 = scmp.lt.s32.totalorder %s4131_s21, %s3327_s7 }
 0x196   : > { %p3330_p10 = scmp.lt.s32.totalorder %s3328_s29, %s3322_s0 }
 0x197   : > { %2606 = vmatpush3.bf16.msra.mxu0 %v2944_v9  ;;  %2614 = vmatpush3.bf16.msra.mxu1 %v2945_v10 }
 0x198   : > { %2619 = vmatprep.subr.bf16.mxu0 %v3466_v0  ;;  %2627 = vmatprep.subr.bf16.mxu1 %v3466_v0  ;;  %p3331_p1 = por %p3330_p10, %p3329_p5 }
 0x19a   : > { %2608 = vmatmul.mubr.msk.bf16.vlgmr.msra.gmra.mrb[4].mxu0 %vm704_vm1, %v645_v6  ;;  %2616 = vmatmul.mubr.msk.bf16.vlgmr.msra.gmra.mrb[4].mxu1 %vm704_vm1, %v645_v6  ;;  %p3332_p11 = pnand %p3331_p1, %p3325_p8 }
 0x19b   : > { %2620 = vmatpush3.bf16.msra.mxu0 %v2946_v11  ;;  %2628 = vmatpush3.bf16.msra.mxu1 %v2947_v12 }
 0x19c   : > { %2621 = vmatprep.subr.bf16.mxu0 %v3466_v0  ;;  %2629 = vmatprep.subr.bf16.mxu1 %v3466_v0 }
 0x19d   : > { %2623 = vmatprep.mubr.msk.bf16.mxu0 %vm3467_vm0, %v3466_v0  ;;  %2631 = vmatprep.mubr.msk.bf16.mxu1 %vm3467_vm0, %v3466_v0 }
 0x19f   : > { %2622 = vmatpush3.bf16.msra.mxu0 %v2948_v13  ;;  %2630 = vmatpush3.bf16.msra.mxu1 %v2949_v14 }
 0x1a0   : > { %2635 = vmatprep.subr.bf16.mxu0 %v3466_v0  ;;  %2643 = vmatprep.subr.bf16.mxu1 %v3466_v0 }
 0x1a2   : > { %2624 = vmatmul.mubr.msk.bf16.vlgmr.msra.gmra.mrb[8].mxu0 %vm704_vm1, %v647_v17  ;;  %2632 = vmatmul.mubr.msk.bf16.vlgmr.msra.gmra.mrb[8].mxu1 %vm704_vm1, %v647_v17 }
 0x1a3   : > { %2636 = vmatpush3.bf16.msra.mxu0 %v2950_v16  ;;  %2644 = vmatpush3.bf16.msra.mxu1 %v2951_v18 }
 0x1a4   : > { %2637 = vmatprep.subr.bf16.mxu0 %v3466_v0  ;;  %2645 = vmatprep.subr.bf16.mxu1 %v3466_v0 }
 0x1a5   : > { %2639 = vmatprep.mubr.msk.bf16.mxu0 %vm3467_vm0, %v3466_v0  ;;  %2647 = vmatprep.mubr.msk.bf16.mxu1 %vm3467_vm0, %v3466_v0 }
 0x1a7   : > { %2638 = vmatpush3.bf16.msra.mxu0 %v2952_v19  ;;  %2646 = vmatpush3.bf16.msra.mxu1 %v2953_v20  ;;  %v2449_v20 = vld [vmem:[#allocation8 + $0x3] ss:$0 sm:$0xff] }
 0x1a8   : > { %2651 = vmatprep.subr.bf16.mxu0 %v3466_v0  ;;  %2659 = vmatprep.subr.bf16.mxu1 %v3466_v0 }
 0x1aa   : > { %2640 = vmatmul.mubr.msk.bf16.vlgmr.msra.gmra.mrb[12].mxu0 %vm704_vm1, %v647_v17  ;;  %2648 = vmatmul.mubr.msk.bf16.vlgmr.msra.gmra.mrb[12].mxu1 %vm704_vm1, %v647_v17 }
 0x1ab   : > { %2652 = vmatpush3.bf16.msra.mxu0 %v2954_v21  ;;  %2655 = vmatprep.mubr.msk.bf16.mxu0 %vm3467_vm0, %v3466_v0 }
 0x1ac   : > { %2653 = vmatprep.subr.bf16.mxu0 %v3466_v0  ;;  %2663 = vmatprep.mubr.msk.bf16.mxu1 %vm3467_vm0, %v3466_v0 }
 0x1ad   : > { %2660 = vmatpush3.bf16.msra.mxu1 %v2955_v22 }
 0x1ae   : > { %2661 = vmatprep.subr.bf16.mxu1 %v3466_v0 }
 0x1af   : > { %2654 = vmatpush3.bf16.msra.mxu0 %v2956_v23 }
 0x1b0   : > { %2667 = vmatprep.subr.bf16.mxu0 %v3466_v0 }
 0x1b1   : > { %2662 = vmatpush3.bf16.msra.mxu1 %v2957_v24 }
 0x1b2   : > { %2656 = vmatmul.mubr.msk.bf16.vlgmr.msra.gmra.mrb[16].mxu0 %vm704_vm1, %v647_v17  ;;  %2675 = vmatprep.subr.bf16.mxu1 %v3466_v0 }
 0x1b3   : > { %2671 = vmatprep.mubr.msk.bf16.mxu0 %vm3467_vm0, %v3466_v0  ;;  %2668 = vmatpush3.bf16.msra.mxu0 %v2958_v25 }
 0x1b4   : > { %2664 = vmatmul.mubr.msk.bf16.vlgmr.msra.gmra.mrb[16].mxu1 %vm704_vm1, %v647_v17  ;;  %2669 = vmatprep.subr.bf16.mxu0 %v3466_v0 }
 0x1b5   : > { %2676 = vmatpush3.bf16.msra.mxu1 %v2959_v26  ;;  %2679 = vmatprep.mubr.msk.bf16.mxu1 %vm3467_vm0, %v3466_v0 }
 0x1b6   : > { %2677 = vmatprep.subr.bf16.mxu1 %v3466_v0 }
 0x1b7   : > { %2670 = vmatpush3.bf16.msra.mxu0 %v2960_v27  ;;  %v2478_v27 = vld [vmem:[#allocation14] ss:$0 sm:$0xff] }
 0x1b8   : > { %2683 = vmatprep.subr.bf16.mxu0 %v3466_v0 }
 0x1b9   : > { %2678 = vmatpush3.bf16.msra.mxu1 %v2961_v28 }
 0x1ba   : > { %2689 = vmatprep.subr.bf16.mxu1 %v3466_v0  ;;  %2672 = vmatmul.mubr.msk.bf16.vlgmr.msra.gmra.mrb[20].mxu0 %vm704_vm1, %v647_v17 }
 0x1bb   : > { %2685 = vmatprep.mubr.msk.bf16.mxu0 %vm3467_vm0, %v3466_v0 }
 0x1bc   : > { %2680 = vmatmul.mubr.msk.bf16.vlgmr.msra.gmra.mrb[20].mxu1 %vm704_vm1, %v647_v17  ;;  %v2448_v17 = vld [vmem:[#allocation8 + $0x2] ss:$0 sm:$0xff] }
 0x1bd   : > { %2691 = vmatprep.mubr.msk.bf16.mxu1 %vm3467_vm0, %v3466_v0 }
 0x265   : > { %v742_v29 = vpop.f32.mrb[0].mxu0  ;;  %v794_v31 = vpop.f32.mrb[0].mxu1 }
 0x266   : > { %v2593_v30 = vpop.f32.mrb[1].mxu0  ;;  %v2601_v33 = vpop.f32.mrb[1].mxu1  ;;  %v743_v1 = vadd.f32 %v2446_v57, %v742_v29  ;;  %v795_v3 = vadd.f32 %v2447_v60, %v794_v31  ;;  %v2479_v29 = vld [vmem:[#allocation14 + $0x1] ss:$0 sm:$0xff] }
 0x267   : > { %v745_v32 = vpop.f32.mrb[2].mxu0  ;;  %v797_v35 = vpop.f32.mrb[2].mxu1 }
 0x268   : > { %v2594_v34 = vpop.f32.mrb[3].mxu0  ;;  %v2602_v36 = vpop.f32.mrb[3].mxu1  ;;  %v1411_v12 = vpack.c.bf16 %v743_v1, %v743_v1  ;;  %v1412_v16 = vpack.c.bf16 %v795_v3, %v795_v3 }
 0x26d   : > { %v846_v37 = vpop.f32.mrb[4].mxu0  ;;  %v898_v39 = vpop.f32.mrb[4].mxu1 }
 0x26e   : > { %v2609_v38 = vpop.f32.mrb[5].mxu0  ;;  %v2617_v41 = vpop.f32.mrb[5].mxu1  ;;  %v847_v23 = vadd.f32 %v2448_v17, %v846_v37  ;;  %v899_v24 = vadd.f32 %v2449_v20, %v898_v39 }
 0x26f   : > { %v849_v40 = vpop.f32.mrb[6].mxu0  ;;  %v901_v43 = vpop.f32.mrb[6].mxu1 }
 0x270   : > { %v2610_v42 = vpop.f32.mrb[7].mxu0  ;;  %v2618_v44 = vpop.f32.mrb[7].mxu1  ;;  %v1413_v25 = vpack.c.bf16 %v847_v23, %v847_v23  ;;  %v1414_v26 = vpack.c.bf16 %v899_v24, %v899_v24  ;;  %v2480_v43 = vld [vmem:[#allocation14 + $0x2] ss:$0 sm:$0xff] }
 0x271   : > { %v2481_v44 = vld [vmem:[#allocation14 + $0x3] ss:$0 sm:$0xff] }
 0x275   : > { %v997_v47 = vpop.f32.mrb[8].mxu0  ;;  %v1049_v49 = vpop.f32.mrb[8].mxu1 }
 0x276   : > { %v998_v48 = vadd.f32 %v2462_v45, %v997_v47  ;;  %v2625_v50 = vpop.f32.mrb[9].mxu0  ;;  %v1050_v51 = vadd.f32 %v2463_v46, %v1049_v49  ;;  %v2633_v53 = vpop.f32.mrb[9].mxu1 }
 0x277   : > { %v1000_v52 = vpop.f32.mrb[10].mxu0  ;;  %v1052_v56 = vpop.f32.mrb[10].mxu1 }
 0x278   : > { %v1415_v54 = vpack.c.bf16 %v998_v48, %v998_v48  ;;  %v2626_v55 = vpop.f32.mrb[11].mxu0  ;;  %v1416_v58 = vpack.c.bf16 %v1050_v51, %v1050_v51  ;;  %v2634_v59 = vpop.f32.mrb[11].mxu1 }
 0x27a   : > { %v1424_v61 = vsel %vm1419_vm2, %v1415_v54, 0  ;;  %v1470_v62 = vsel %vm1419_vm2, %v1416_v58, 0 }
 0x27b   : > { %2684 = vmatpush3.bf16.xpose.msra.mxu0 %v1424_v61  ;;  %2690 = vmatpush3.bf16.xpose.msra.mxu1 %v1470_v62 }
 0x27c   : > { %2695 = vmatprep.subr.bf16.mxu0 %v3466_v0  ;;  %2701 = vmatprep.subr.bf16.mxu1 %v3466_v0 }
 0x27d   : > { %v1101_v4 = vpop.f32.mrb[12].mxu0  ;;  %v1153_v7 = vpop.f32.mrb[12].mxu1 }
 0x27e   : > { %v1102_v6 = vadd.f32 %v2464_v63, %v1101_v4  ;;  %v2641_v8 = vpop.f32.mrb[13].mxu0  ;;  %v1154_v9 = vadd.f32 %v2465_v2, %v1153_v7  ;;  %v2649_v11 = vpop.f32.mrb[13].mxu1 }
 0x27f   : > { %v1104_v10 = vpop.f32.mrb[14].mxu0  ;;  %v1156_v15 = vpop.f32.mrb[14].mxu1 }
 0x280   : > { %v1417_v13 = vpack.c.bf16 %v1102_v6, %v1102_v6  ;;  %v2642_v14 = vpop.f32.mrb[15].mxu0  ;;  %v1418_v18 = vpack.c.bf16 %v1154_v9, %v1154_v9  ;;  %v2650_v19 = vpop.f32.mrb[15].mxu1 }
 0x282   : > { %v1516_v21 = vsel %vm1419_vm2, %v1417_v13, 0  ;;  %2686 = vmatmul.mubr.msk.bf16.vlgmr.msra.gmra.mrb[24].mxu0 %vm1419_vm2, %v1411_v12  ;;  %v1562_v22 = vsel %vm1419_vm2, %v1418_v18, 0  ;;  %2692 = vmatmul.mubr.msk.bf16.vlgmr.msra.gmra.mrb[24].mxu1 %vm1419_vm2, %v1412_v16 }
 0x283   : > { %2696 = vmatpush3.bf16.xpose.msra.mxu0 %v1516_v21  ;;  %2702 = vmatpush3.bf16.xpose.msra.mxu1 %v1562_v22 }
 0x284   : > { %2697 = vmatprep.mubr.msk.bf16.mxu0 %vm3467_vm0, %v3466_v0  ;;  %2703 = vmatprep.mubr.msk.bf16.mxu1 %vm3467_vm0, %v3466_v0 }
 0x285   : > { %2707 = vmatprep.subr.bf16.mxu0 %v3466_v0  ;;  %2713 = vmatprep.subr.bf16.mxu1 %v3466_v0  ;;  %v1249_v28 = vpop.f32.mrb[16].mxu0 }
 0x286   : > { %v1250_v30 = vadd.f32 %v2478_v27, %v1249_v28  ;;  %v2657_v31 = vpop.f32.mrb[17].mxu0 }
 0x287   : > { %v1252_v32 = vpop.f32.mrb[18].mxu0  ;;  %v1301_v33 = vpop.f32.mrb[16].mxu1 }
 0x288   : > { %v1660_v34 = vpack.c.bf16 %v1250_v30, %v1250_v30  ;;  %v2658_v35 = vpop.f32.mrb[19].mxu0  ;;  %v1302_v36 = vadd.f32 %v2479_v29, %v1301_v33  ;;  %v2665_v37 = vpop.f32.mrb[17].mxu1 }
 0x289   : > { %v1304_v38 = vpop.f32.mrb[18].mxu1 }
 0x28a   : > { %2698 = vmatmul.mubr.msk.bf16.vlgmr.msra.gmra.mrb[28].mxu0 %vm1419_vm2, %v1413_v25  ;;  %2704 = vmatmul.mubr.msk.bf16.vlgmr.msra.gmra.mrb[28].mxu1 %vm1419_vm2, %v1414_v26  ;;  %v1669_v39 = vsel %vm1667_vm3, %v1660_v34, 0  ;;  %v1661_v40 = vpack.c.bf16 %v1302_v36, %v1302_v36  ;;  %v2666_v41 = vpop.f32.mrb[19].mxu1 }
 0x28b   : > { %2709 = vmatprep.mubr.msk.bf16.mxu0 %vm3467_vm0, %v3466_v0  ;;  %2715 = vmatprep.mubr.msk.bf16.mxu1 %vm3467_vm0, %v3466_v0 }
 0x28c   : > { %2708 = vmatpush3.bf16.msra.mxu0 %v1669_v39  ;;  %v1715_v42 = vsel %vm1667_vm3, %v1661_v40, 0 }
 0x28d   : > { %2719 = vmatprep.subr.bf16.mxu0 %v3466_v0  ;;  %2714 = vmatpush3.bf16.msra.mxu1 %v1715_v42  ;;  %v1353_v45 = vpop.f32.mrb[20].mxu0 }
 0x28e   : > { %2725 = vmatprep.subr.bf16.mxu1 %v3466_v0  ;;  %v1354_v47 = vadd.f32 %v2480_v43, %v1353_v45  ;;  %v2673_v48 = vpop.f32.mrb[21].mxu0 }
 0x28f   : > { %v1405_v46 = vpop.f32.mrb[20].mxu1  ;;  %v1356_v51 = vpop.f32.mrb[22].mxu0 }
 0x290   : > { %v1406_v49 = vadd.f32 %v2481_v44, %v1405_v46  ;;  %v2681_v50 = vpop.f32.mrb[21].mxu1  ;;  %v1662_v53 = vpack.c.bf16 %v1354_v47, %v1354_v47  ;;  %v2674_v54 = vpop.f32.mrb[23].mxu0 }
 0x291   : > { %v1408_v52 = vpop.f32.mrb[22].mxu1 }
 0x292   : > { %v1663_v55 = vpack.c.bf16 %v1406_v49, %v1406_v49  ;;  %v2682_v56 = vpop.f32.mrb[23].mxu1  ;;  %v4056_v57 = vsel %vm1667_vm3, %v1662_v53, 0 }
 0x294   : > { %v4059_v58 = vsel %vm1667_vm3, %v1663_v55, 0 }
 0x355   : > { %v1460_v59 = vpop.f32.mrb[24].mxu0  ;;  %v1506_v61 = vpop.f32.mrb[24].mxu1 }
 0x356   : > { %v1604_v60 = vmul.f32 0.35355338, %v1460_v59  ;;  %v2687_v62 = vpop.f32.mrb[25].mxu0  ;;  %v2693_v63 = vpop.f32.mrb[25].mxu1  ;;  %v1605_v2 = vmul.f32 0.35355338, %v1506_v61 }
 0x357   : > { %v1463_v1 = vpop.f32.mrb[26].mxu0  ;;  %v1509_v3 = vpop.f32.mrb[26].mxu1 }
 0x358   : > { %v2688_v4 = vpop.f32.mrb[27].mxu0  ;;  %v1608_v6 = vsel %vm1419_vm2, %v1604_v60, -inf  ;;  %v2694_v7 = vpop.f32.mrb[27].mxu1  ;;  %v1611_v8 = vsel %vm1419_vm2, %v1605_v2, -inf }
 0x359   : > { %1609 = vmax.xlane.f32.xlu0 %v1608_v6 }
 0x35d   : > { %1612 = vmax.xlane.f32.xlu0 %v1611_v8  ;;  %v1552_v9 = vpop.f32.mrb[28].mxu0  ;;  %v1598_v10 = vpop.f32.mrb[28].mxu1 }
 0x35e   : > { %v1606_v11 = vmul.f32 0.35355338, %v1552_v9  ;;  %v2699_v12 = vpop.f32.mrb[29].mxu0  ;;  %v2705_v13 = vpop.f32.mrb[29].mxu1  ;;  %v1607_v15 = vmul.f32 0.35355338, %v1598_v10 }
 0x35f   : > { %v1555_v14 = vpop.f32.mrb[30].mxu0  ;;  %v1601_v16 = vpop.f32.mrb[30].mxu1 }
 0x360   : > { %v2700_v17 = vpop.f32.mrb[31].mxu0  ;;  %v1614_v18 = vsel %vm1419_vm2, %v1606_v11, -inf  ;;  %v2706_v19 = vpop.f32.mrb[31].mxu1  ;;  %v1617_v20 = vsel %vm1419_vm2, %v1607_v15, -inf }
 0x361   : > { %1615 = vmax.xlane.f32.xlu1 %v1614_v18 }
 0x365   : > { %1618 = vmax.xlane.f32.xlu1 %v1617_v20 }
 0x3e6   : > { %v1610_v21 = vpop.xlane.xlu0 %1609 }
 0x3e7   : > { %v1620_v22 = vsub.f32 %v1604_v60, %v1610_v21 }
 0x3e9   : > { %v1624_v23 = vmul.f32 1.442695, %v1620_v22 }
 0x3ea   : > { %v1613_v24 = vpop.xlane.xlu0 %1612 }
 0x3eb   : > { %2964 = vpow2.f32 %v1624_v23  ;;  %v1621_v25 = vsub.f32 %v1605_v2, %v1613_v24 }
 0x3ed   : > { %v1626_v26 = vmul.f32 1.442695, %v1621_v25 }
 0x3ee   : > { %v1616_v27 = vpop.xlane.xlu1 %1615 }
 0x3ef   : > { %2966 = vpow2.f32 %v1626_v26  ;;  %v1622_v28 = vsub.f32 %v1606_v11, %v1616_v27 }
 0x3f1   : > { %v1628_v29 = vmul.f32 1.442695, %v1622_v28  ;;  %v2962_v28 = vld [vmem:[#allocation16] sm:$0xff]  }
 0x3f2   : > { %v1619_v30 = vpop.xlane.xlu1 %1618 }
 0x3f3   : > { %2968 = vpow2.f32 %v1628_v29  ;;  %v1623_v31 = vsub.f32 %v1607_v15, %v1619_v30  ;;  %v2963_v29 = vld [vmem:[#allocation16 + $0x8] sm:$0xff]  }
 0x3f5   : > { %v2965_v32 = vpop.eup %2964  ;;  %v1630_v33 = vmul.f32 1.442695, %v1623_v31 }
 0x3f6   : > { %v1632_v34 = vsel %vm1419_vm2, %v2965_v32, 0.0 }
 0x3f7   : > { %2970 = vpow2.f32 %v1630_v33  ;;  %1633 = vadd.xlane.f32.xlu0 %v1632_v34 }
 0x3f9   : > { %v2967_v35 = vpop.eup %2966 }
 0x3fa   : > { %v1635_v36 = vsel %vm1419_vm2, %v2967_v35, 0.0 }
 0x3fb   : > { %1636 = vadd.xlane.f32.xlu1 %v1635_v36 }
 0x3fd   : > { %v2969_v37 = vpop.eup %2968 }
 0x3fe   : > { %v1638_v38 = vsel %vm1419_vm2, %v2969_v37, 0.0 }
 0x3ff   : > { %1639 = vadd.xlane.f32.xlu0 %v1638_v38 }
 0x401   : > { %v2971_v39 = vpop.eup %2970 }
 0x402   : > { %v1641_v40 = vsel %vm1419_vm2, %v2971_v39, 0.0 }
 0x403   : > { %1642 = vadd.xlane.f32.xlu1 %v1641_v40 }
 0x484   : > { %v1634_v41 = vpop.xlane.xlu0 %1633 }
 0x485   : > { %2972 = vrcp.f32 %v1634_v41 }
 0x488   : > { %v1637_v42 = vpop.xlane.xlu1 %1636 }
 0x489   : > { %2974 = vrcp.f32 %v1637_v42 }
 0x48c   : > { %v1640_v43 = vpop.xlane.xlu0 %1639 }
 0x48d   : > { %2976 = vrcp.f32 %v1640_v43 }
 0x48f   : > { %v2973_v44 = vpop.eup %2972 }
 0x490   : > { %v1648_v45 = vmul.f32 %v2973_v44, %v2965_v32  ;;  %v1643_v46 = vpop.xlane.xlu1 %1642 }
 0x491   : > { %2978 = vrcp.f32 %v1643_v46 }
 0x492   : > { %1652 = vst.msk [vmem:[%s4070_s23] sm:$0xff] %vm1419_vm2, %v1648_v45  ;;  %v1656_v47 = vpack.c.bf16 %v1648_v45, %v1648_v45 }
 0x493   : > { %v2975_v48 = vpop.eup %2974 }
 0x494   : > { %v1649_v49 = vmul.f32 %v2975_v48, %v2967_v35  ;;  %2710 = vmatmul.mubr.msk.bf16.vlgmr.msra.gmra.mrb[32].mxu0 %vm1419_vm2, %v1656_v47 }
 0x495   : > { %2720 = vmatpush3.bf16.msra.mxu0 %v4056_v57  ;;  %2721 = vmatprep.mubr.msk.bf16.mxu0 %vm3467_vm0, %v3466_v0  ;;  %v1851_v57 = vlaneseq }
 0x496   : > { %1653 = vst.msk [vmem:[%s4070_s23 + $0x8] sm:$0xff] %vm1419_vm2, %v1649_v49  ;;  %v1657_v50 = vpack.c.bf16 %v1649_v49, %v1649_v49  ;;  %2731 = vmatprep.subr.bf16.mxu0 %v3466_v0 }
 0x497   : > { %v2977_v51 = vpop.eup %2976  ;;  %v1854_v2 = vand.u32 127, %v1851_v57 }
 0x498   : > { %v1650_v52 = vmul.f32 %v2977_v51, %v2969_v37  ;;  %2716 = vmatmul.mubr.msk.bf16.vlgmr.msra.gmra.mrb[32].mxu1 %vm1419_vm2, %v1657_v50 }
 0x499   : > { %2726 = vmatpush3.bf16.msra.mxu1 %v4059_v58  ;;  %2727 = vmatprep.mubr.msk.bf16.mxu1 %vm3467_vm0, %v3466_v0  ;;  %v1852_v58 = vshrl.u32 %v1851_v57, 7 }
 0x49a   : > { %1654 = vst.msk [vmem:[%s4070_s23 + $0x10] sm:$0xff] %vm1419_vm2, %v1650_v52  ;;  %v1658_v53 = vpack.c.bf16 %v1650_v52, %v1650_v52  ;;  %2739 = vmatprep.subr.bf16.mxu1 %v3466_v0  ;;  %v2506_v52 = vld [vmem:[#allocation17] ss:$0 sm:$0xff] }
 0x49b   : > { %v2979_v54 = vpop.eup %2978  ;;  %v1855_v60 = vmul.u32 4, %v1852_v58 }
 0x49c   : > { %v1651_v55 = vmul.f32 %v2979_v54, %v2971_v39  ;;  %2722 = vmatmul.mubr.msk.bf16.vlgmr.msra.gmra.mrb[36].mxu0 %vm1419_vm2, %v1658_v53 }
 0x49d   : > { %2735 = vmatprep.mubr.msk.bf16.mxu0 %vm3467_vm0, %v3466_v0  ;;  %v1902_v3 = vadd.s32 1, %v1855_v60  ;;  %vm1856_vm4 = vcmp.eq.s32.totalorder %v1854_v2, %v1855_v60  ;;  %v1949_v16 = vadd.s32 2, %v1855_v60  ;;  %v1996_v17 = vadd.s32 3, %v1855_v60 }
 0x49e   : > { %1655 = vst.msk [vmem:[%s4070_s23 + $0x18] sm:$0xff] %vm1419_vm2, %v1651_v55  ;;  %v1659_v56 = vpack.c.bf16 %v1651_v55, %v1651_v55  ;;  %v1857_v13 = vsel %vm1856_vm4, 1.0, %v3466_v0 }
 0x49f   : > { %vm1903_vm5 = vcmp.eq.s32.totalorder %v1854_v2, %v1902_v3  ;;  %v1858_v21 = vpack.c.bf16 %v1857_v13, %v1857_v13  ;;  %vm1950_vm6 = vcmp.eq.s32.totalorder %v1854_v2, %v1949_v16  ;;  %vm1997_vm7 = vcmp.eq.s32.totalorder %v1854_v2, %v1996_v17 }
 0x4a0   : > { %2728 = vmatmul.mubr.msk.bf16.vlgmr.msra.gmra.mrb[36].mxu1 %vm1419_vm2, %v1659_v56  ;;  %v1904_v14 = vsel %vm1903_vm5, 1.0, %v3466_v0  ;;  %v1951_v24 = vsel %vm1950_vm6, 1.0, %v3466_v0  ;;  %v1998_v25 = vsel %vm1997_vm7, 1.0, %v3466_v0 }
 0x4a1   : > { %2743 = vmatprep.mubr.msk.bf16.mxu1 %vm3467_vm0, %v3466_v0  ;;  %v1905_v22 = vpack.c.bf16 %v1904_v14, %v1904_v14  ;;  %v1952_v26 = vpack.c.bf16 %v1951_v24, %v1951_v24  ;;  %v1999_v27 = vpack.c.bf16 %v1998_v25, %v1998_v25 }
 0x567   : > { %v1705_v59 = vpop.f32.mrb[32].mxu0 }
 0x568   : > { %v2711_v61 = vpop.f32.mrb[33].mxu0 }
 0x569   : > { %v1708_v62 = vpop.f32.mrb[34].mxu0 }
 0x56a   : > { %v2712_v63 = vpop.f32.mrb[35].mxu0 }
 0x56b   : > { %v1751_v1 = vpop.f32.mrb[32].mxu1 }
 0x56c   : > { %v1849_v4 = vpack.c.bf16 %v1751_v1, %v1705_v59  ;;  %v2717_v6 = vpop.f32.mrb[33].mxu1 }
 0x56d   : > { %v1754_v7 = vpop.f32.mrb[34].mxu1 }
 0x56e   : > { %v2718_v8 = vpop.f32.mrb[35].mxu1  ;;  %2732 = vmatpush3.bf16.msra.mxu0 %v1849_v4  ;;  %2740 = vmatpush3.bf16.msra.mxu1 %v1849_v4 }
 0x56f   : > { %v1797_v9 = vpop.f32.mrb[36].mxu0  ;;  %2733 = vmatprep.subr.bf16.mxu0 %v3466_v0  ;;  %2741 = vmatprep.subr.bf16.mxu1 %v3466_v0 }
 0x570   : > { %v2723_v10 = vpop.f32.mrb[37].mxu0 }
 0x571   : > { %v1800_v11 = vpop.f32.mrb[38].mxu0 }
 0x572   : > { %v2724_v12 = vpop.f32.mrb[39].mxu0 }
 0x573   : > { %v1843_v15 = vpop.f32.mrb[36].mxu1 }
 0x574   : > { %v1850_v18 = vpack.c.bf16 %v1843_v15, %v1797_v9  ;;  %v2729_v19 = vpop.f32.mrb[37].mxu1 }
 0x575   : > { %v1846_v20 = vpop.f32.mrb[38].mxu1 }
 0x576   : > { %v2730_v23 = vpop.f32.mrb[39].mxu1  ;;  %2734 = vmatpush3.bf16.msra.mxu0 %v1850_v18  ;;  %2742 = vmatpush3.bf16.msra.mxu1 %v1850_v18 }
 0x577   : > { %2747 = vmatprep.subr.bf16.mxu0 %v3466_v0  ;;  %2755 = vmatprep.subr.bf16.mxu1 %v3466_v0 }
 0x579   : > { %2736 = vmatmul.mubr.msk.bf16.vlgmr.msra.gmra.mrb[40].mxu0 %vm704_vm1, %v1858_v21  ;;  %2744 = vmatmul.mubr.msk.bf16.vlgmr.msra.gmra.mrb[40].mxu1 %vm704_vm1, %v1905_v22 }
 0x57a   : > { %2748 = vmatpush3.bf16.msra.mxu0 %v1849_v4  ;;  %2756 = vmatpush3.bf16.msra.mxu1 %v1849_v4 }
 0x57b   : > { %2749 = vmatprep.subr.bf16.mxu0 %v3466_v0  ;;  %2757 = vmatprep.subr.bf16.mxu1 %v3466_v0 }
 0x57c   : > { %2751 = vmatprep.mubr.msk.bf16.mxu0 %vm3467_vm0, %v3466_v0  ;;  %2759 = vmatprep.mubr.msk.bf16.mxu1 %vm3467_vm0, %v3466_v0 }
 0x57e   : > { %2750 = vmatpush3.bf16.msra.mxu0 %v1850_v18  ;;  %2758 = vmatpush3.bf16.msra.mxu1 %v1850_v18 }
 0x57f   : > { %2763 = vmatprep.subr.bf16.mxu0 %v3466_v0 }
 0x581   : > { %2752 = vmatmul.mubr.msk.bf16.vlgmr.msra.gmra.mrb[44].mxu0 %vm704_vm1, %v1952_v26  ;;  %2760 = vmatmul.mubr.msk.bf16.vlgmr.msra.gmra.mrb[44].mxu1 %vm704_vm1, %v1999_v27 }
 0x582   : > { %2767 = vmatprep.mubr.msk.bf16.mxu0 %vm3467_vm0, %v3466_v0  ;;  %2764 = vmatpush3.bf16.msra.mxu0 %v2962_v28 }
 0x583   : > { %2765 = vmatprep.subr.bf16.mxu0 %v3466_v0 }
 0x586   : > { %2766 = vmatpush3.bf16.msra.mxu0 %v2963_v29 }
 0x64c   : > { %v1896_v30 = vpop.f32.mrb[40].mxu0  ;;  %v1943_v31 = vpop.f32.mrb[40].mxu1 }
 0x64d   : > { %2044 = vrot.lane.b32.xlu0 %v1943_v31, %s3468_s30  ;;  %v2737_v32 = vpop.f32.mrb[41].mxu0  ;;  %v2745_v33 = vpop.f32.mrb[41].mxu1 }
 0x64e   : > { %v1899_v34 = vpop.f32.mrb[42].mxu0  ;;  %v1946_v35 = vpop.f32.mrb[42].mxu1 }
 0x64f   : > { %v2738_v36 = vpop.f32.mrb[43].mxu0  ;;  %v2746_v37 = vpop.f32.mrb[43].mxu1 }
 0x654   : > { %v1990_v38 = vpop.f32.mrb[44].mxu0  ;;  %v2037_v39 = vpop.f32.mrb[44].mxu1 }
 0x655   : > { %2048 = vrot.lane.b32.xlu1 %v1990_v38, %s3469_s20  ;;  %v2753_v40 = vpop.f32.mrb[45].mxu0  ;;  %v2761_v41 = vpop.f32.mrb[45].mxu1 }
 0x656   : > { %v1993_v0 = vpop.f32.mrb[46].mxu0  ;;  %v2040_v42 = vpop.f32.mrb[46].mxu1 }
 0x657   : > { %v2754_v43 = vpop.f32.mrb[47].mxu0  ;;  %v2762_v44 = vpop.f32.mrb[47].mxu1 }
 0x659   : > { %2052 = vrot.lane.b32.xlu1 %v2037_v39, %s3470_s8 }
 0x6bf   : > { %v2045_v45 = vpop.permute.xlu0 %2044 }
 0x6c0   : > { %v2055_v47 = vsel %vm1419_vm2, %v1896_v30, %v2045_v45 }
 0x6c7   : > { %v2049_v46 = vpop.permute.xlu1 %2048 }
 0x6c8   : > { %v2057_v48 = vsel %vm2056_vm8, %v2055_v47, %v2049_v46 }
 0x6cb   : > { %v2053_v49 = vpop.permute.xlu1 %2052 }
 0x6cc   : > { %v2059_v50 = vsel %vm2058_vm9, %v2057_v48, %v2053_v49 }
 0x6cd   : > { %v2060_v51 = vpack.c.bf16 %v2059_v50, %v2059_v50 }
 0x6cf   : > { %2768 = vmatmul.mubr.msk.bf16.vlgmr.msra.gmra.mrb[48].mxu0 %vm704_vm1, %v2060_v51 }
 0x7a2   : > { %v2121_v53 = vpop.f32.mrb[48].mxu0 }
 0x7a3   : > { %v2122_v54 = vadd.f32 %v2506_v52, %v2121_v53  ;;  %v2769_v55 = vpop.f32.mrb[49].mxu0 }
 0x7a4   : > { %v2124_v56 = vpop.f32.mrb[50].mxu0 }
 0x7a5   : > { %v2770_v57 = vpop.f32.mrb[51].mxu0  ;;  %v2127_v58 = vadd.f32 %v2122_v54, %v3967_v5 }
 0x7a7   : > { %v2130_v59 = vsel %vm704_vm1, %v2127_v58, 0.0 }
 0x7a8   : > { %2131 = vadd.xlane.f32.xlu1 %v2130_v59 }
 0x835   : > { %v2132_v60 = vpop.xlane.xlu1 %2131 }
 0x836   : > { %v2134_v61 = vmul.f32 0.03125, %v2132_v60 }
 0x838   : > { %v2135_v62 = vsub.f32 %v2127_v58, %v2134_v61 }
 0x83a   : > { %v2136_v63 = vmul.f32 %v2135_v62, %v2135_v62 }
 0x83c   : > { %v2137_v1 = vsel %vm704_vm1, %v2136_v63, 0.0 }
 0x83d   : > { %2138 = vadd.xlane.f32.xlu0 %v2137_v1 }
 0x83e   : > { %3335 = shalt.err (!%p3332_p11)
}
 0x83f   : > { %s3336_s23 = scalar_lea.hbm %s4129_s3, 512  ;;  %s3340_s5 = scalar_lea.hbm %s4282_s15, 1024 }
 0x840   : > { %p3337_p12 = scmp.ne.s32.totalorder %s4129_s3, %s3336_s23  ;;  %p3341_p9 = scmp.lt.u32.totalorder %s4129_s3, %s4282_s15 }
 0x841   : > { %p3342_p0 = scmp.lt.u32.totalorder %s3340_s5, %s3336_s23  ;;  %p3344_p3 = scmp.lt.u32.totalorder %s3336_s23, %s4129_s3 }
 0x842   : > { %p3338_p13 = pnand %p3337_p12, %p4283_p6 }
 0x843   : > { %p3343_p2 = por %p3342_p0, %p3341_p9 }
 0x844   : > { %p3339_p7 = pneg %p3338_p13 }
 0x845   : > { %p3345_p4 = por %p3344_p3, %p3343_p2 }
 0x847   : > { %p3346_p8 = pnand %p3345_p4, %p3339_p7 }
 0x849   : > { %3349 = shalt.err (!%p3346_p8)
}
 0x84a   : > { %s3472_s0 = smov 128   ;;  %v2510_v6 = vld [vmem:[#allocation19] ss:$0 sm:$0xff]  ;;  %v2511_v8 = vld [vmem:[#allocation20] ss:$0 sm:$0xff]  ;;  %s2514_s1 = sshll.u32 %s3565_s14, 7 }
 0x84b   : > { %2816 = dma.vmem_to_hbm [thread:$0]  (%p4283_p6), %s4131_s21, 512, %s4129_s3, %s2165_s12, %s3472_s0, %s3472_s0, %s3468_s30  }
 0x84c   : > { %s635_s7 = scalar_lea.vmem [#allocation22], %s3919_s13  ;;  %s4284_s8 = sld [smem:[#allocation45_spill]] }
 0x84d   : > { %s2178_s29 = sshll.u32 %s635_s7, 4  ;;  %s2160_s30 = scalar_lea.sflag [#allocation4], %s3916_s6  ;;  %s4165_s29 = int_to_ptr.vmem [resolvable:$true] %s2178_s29 }
 0x84e   : > { %s3350_s21 = scalar_lea.vmem %s4165_s29, 128  ;;  %s3473_s14 = smov [#allocation22]  }
 0x84f   : > { %p3351_p5 = scmp.ne.s32.totalorder %s4165_s29, %s3350_s21  ;;  %s3354_s13 = sshll.u32 %s3473_s14, 4  ;;  %s3355_s13 = int_to_ptr.vmem [resolvable:$false] %s3354_s13 }
 0x850   : > { %s3356_s3 = scalar_lea.vmem %s3355_s13, 256  ;;  %p3357_p11 = scmp.lt.s32.totalorder %s4165_s29, %s3355_s13 }
 0x851   : > { %p3352_p10 = pnand %p3351_p5, %p4283_p6  ;;  %p3358_p12 = scmp.lt.s32.totalorder %s3356_s3, %s3350_s21 }
 0x852   : > { %s4163_s5 = scalar_lea.hbm %s4284_s8, %s2514_s1 }
 0x853   : > { %p3353_p1 = pneg %p3352_p10  ;;  %p3359_p13 = por %p3358_p12, %p3357_p11 }
 0x855   : > { %p3360_p7 = pnand %p3359_p13, %p3353_p1 }
 0x8ca   : > { %v2139_v5 = vpop.xlane.xlu0 %2138 }
 0x8cb   : > { %v2140_v2 = vmul.f32 0.03125, %v2139_v5 }
 0x8cd   : > { %v2141_v3 = vadd.f32 1e-05, %v2140_v2 }
 0x8cf   : > { %2980 = vrsqrt.f32 %v2141_v3 }
 0x8d9   : > { %v2981_v4 = vpop.eup %2980 }
 0x8da   : > { %v2143_v7 = vmul.f32 %v2981_v4, %v2135_v62 }
 0x8dc   : > { %v2150_v9 = vmul.f32 %v2510_v6, %v2143_v7 }
 0x8de   : > { %v2157_v10 = vadd.f32 %v2511_v8, %v2150_v9 }
 0x8e0   : > { %2158 = vst.msk [vmem:[%s635_s7] sm:$0xff] %vm704_vm1, %v2157_v10 }
 0x8e1   : > { %3363 = shalt.err (!%p3360_p7)
}
 0x8e2   : > { %s3364_s6 = scalar_lea.hbm %s4163_s5, 128  ;;  %s3368_s16 = scalar_lea.hbm %s4284_s8, 256 }
 0x8e3   : > { %p3365_p9 = scmp.ne.s32.totalorder %s4163_s5, %s3364_s6  ;;  %p3369_p3 = scmp.lt.u32.totalorder %s4163_s5, %s4284_s8 }
 0x8e4   : > { %p3370_p4 = scmp.lt.u32.totalorder %s3368_s16, %s3364_s6  ;;  %p3372_p5 = scmp.lt.u32.totalorder %s3364_s6, %s4163_s5 }
 0x8e5   : > { %p3366_p0 = pnand %p3365_p9, %p4283_p6 }
 0x8e6   : > { %p3371_p8 = por %p3370_p4, %p3369_p3 }
 0x8e7   : > { %p3367_p2 = pneg %p3366_p0 }
 0x8e8   : > { %p3373_p10 = por %p3372_p5, %p3371_p8 }
 0x8ea   : > { %p3374_p1 = pnand %p3373_p10, %p3367_p2 }
 0x8ec   : > { %3377 = shalt.err (!%p3374_p1)
}
 0x8ed   : > { %2815 = dma.vmem_to_hbm [thread:$0]  (%p4283_p6), %s4165_s29, 128, %s4163_s5, %s2160_s30  }
 0x8ee PF: > { %s2206_s7 = sand.u32 1, %s3436_s25   ;;  %p4285_p11 = scmp.ne.s32.totalorder %s4263_s19, 0 }
 0x8ef   : > { %p4286_p12 = scmp.ge.s32.totalorder %s3448_s28, 2  ;;  %s2207_s23 = scalar_lea.sflag [#allocation4], %s2206_s7 }
 0x8f1   : > { %p2858_p13 = pnand %p4286_p12, %p4285_p11 }
 0x8f3   : > { %3427 = dma.done.wait (!%p2858_p13), %s2207_s23, 128  }
 0x8f4   : > { %3429 = vsyncadd (!%p2858_p13), %s2207_s23, 4294967168  ;;  %s2216_s20 = scalar_lea.sflag [#allocation24], %s2206_s7 }
 0x8f5   : > { %3431 = dma.done.wait (!%p2858_p13), %s2216_s20, 512  }
 0x8f6   : > { %3433 = vsyncadd (!%p2858_p13), %s2216_s20, 4294966784  ;;  %p38_p6 = scmp.ge.s32.totalorder %s3809_s18, 4   ;;  %s4287_s25 = smov %s3440_s26 }
 0x8f7   : > { %s4288_s26 = smov %s3444_s27  ;;  %s4289_s27 = smov %s3820_s22 }
 0x8f8   : > { %s4290_s28 = smov %s3809_s18  ;;  %40 = sbr.rel (!%p38_p6) target bundleno = 26 (0x1a), region = 183 }
 0x8ff   :  { %2221 = vsyncpa [#allocation3], 1 }
 0x900   :  { %2223 = vsyncpa [#allocation3 + $0x1], 1 }
 0x901   :  { %2224 = vsyncpa [#allocation6], 1 }
 0x902   :  { %2226 = vsyncpa [#allocation6 + $0x1], 1 }
 0x903   :  { %2227 = vsyncpa [#allocation9], 1 }
 0x904   :  { %2228 = vsyncpa [#allocation12], 1 }
 0x905   :  { %2229 = vsyncpa [#allocation15], 1 }
 0x906   :  { %2230 = vsyncpa [#allocation18], 1 }
 0x907   :  { %2231 = vsyncpa [#allocation21], 1 }
 0x908   :  { %2232 = vsyncpa [#allocation4], 1 }
 0x909   :  { %2234 = vsyncpa [#allocation4 + $0x1], 1 }
 0x90a   :  { %2235 = vsyncpa [#allocation24], 1 }
 0x90b   :  { %2237 = vsyncpa [#allocation24 + $0x1], 1 }

</bundles_post_ra>
